<compile_context>
chip_gen: v5e
topology: v5e:2x2
jax: 0.10.0
libtpu: 0.0.40
codegen_flags: <defaults>
</compile_context>

<pallas_src>
import functools
import math

import jax
import jax.numpy as jnp
from jax.experimental import pallas as pl
from jax.experimental.pallas import tpu as pltpu

LN_EPS = 1e-5                       # nn.LayerNorm default
VMEM_LIMIT_BYTES = 64 * 1024 * 1024  # raise v5e's 16 MiB default scoped limit explicitly


def _layernorm(x, w, b):
    mean = jnp.mean(x, axis=-1, keepdims=True)
    var = jnp.mean((x - mean) ** 2, axis=-1, keepdims=True)   # biased, like PyTorch
    return (x - mean) * jax.lax.rsqrt(var + LN_EPS) * w + b


def _erf(x):
    # Abramowitz & Stegun 7.1.26 rational approximation, |err| < 1.5e-7.
    # Uses only exp / divide / mul-add / where, which all lower cleanly in Mosaic.
    a1, a2, a3, a4, a5 = 0.254829592, -0.284496736, 1.421413741, -1.453152027, 1.061405429
    p = 0.3275911
    sgn = jnp.where(x >= 0.0, 1.0, -1.0)
    ax = jnp.abs(x)
    t = 1.0 / (1.0 + p * ax)
    poly = ((((a5 * t + a4) * t + a3) * t + a2) * t + a1) * t
    return sgn * (1.0 - poly * jnp.exp(-ax * ax))


def _gelu_exact(x):
    # nn.GELU() default = exact erf-based GELU.
    return 0.5 * x * (1.0 + _erf(x * (1.0 / math.sqrt(2.0))))


def _softmax_last(x):
    m = jnp.max(x, axis=-1, keepdims=True)
    e = jnp.exp(x - m)
    return e * pl.reciprocal(jnp.sum(e, axis=-1, keepdims=True), approx=True)


def transformer_stack_kernel(n_heads,
                             x_ref, wqkv_ref, wo_ref, w1_ref, b1_ref,
                             w2_ref, b2_ref, ln1w_ref, ln1b_ref,
                             ln2w_ref, ln2b_ref, o_ref):
    layer = pl.program_id(1)

    # Layer 0: seed the resident residual stream from the input slab.
    @pl.when(layer == 0)
    def _():
        o_ref[0] = x_ref[0]

    x = o_ref[0]                                    # (S, D) f32 residual stream
    seq, d_model = x.shape
    d_k = d_model // n_heads

    # ---- Multi-head self-attention on LayerNorm(x) ----
    h = _layernorm(x, ln1w_ref[0], ln1b_ref[0])     # f32 stats
    qkv = jnp.dot(h.astype(jnp.bfloat16), wqkv_ref[0],
                  preferred_element_type=jnp.float32)            # (S, 3D), one MXU pass
    qkv = qkv.astype(jnp.bfloat16)
    q = qkv[:, :d_model]
    k = qkv[:, d_model:2 * d_model]
    v = qkv[:, 2 * d_model:]
    # (S, D) -> (H, S, d_k): batched-head layout, no per-head loop / concat.
    qh = q.reshape(seq, n_heads, d_k).transpose(1, 0, 2)
    kh = k.reshape(seq, n_heads, d_k).transpose(1, 0, 2)
    vh = v.reshape(seq, n_heads, d_k).transpose(1, 0, 2)
    # 1/sqrt(d_k) already folded into the Q columns of wqkv at pack time.
    scores = jnp.einsum('hqd,hkd->hqk', qh, kh,
                        preferred_element_type=jnp.float32)      # (H, S, S) f32
    probs = _softmax_last(scores)                                # f32 stats
    ctx = jnp.einsum('hqk,hkd->hqd', probs.astype(jnp.bfloat16), vh,
                     preferred_element_type=jnp.float32)         # (H, S, d_k)
    heads = ctx.astype(jnp.bfloat16).transpose(1, 0, 2).reshape(seq, d_model)
    attn = jnp.dot(heads, wo_ref[0], preferred_element_type=jnp.float32)
    x = x + attn                                    # residual 1 (f32)

    # ---- MLP on LayerNorm(x) ----
    h2 = _layernorm(x, ln2w_ref[0], ln2b_ref[0])
    m = jnp.dot(h2.astype(jnp.bfloat16), w1_ref[0],
                preferred_element_type=jnp.float32) + b1_ref[0]
    m = _gelu_exact(m)
    m = jnp.dot(m.astype(jnp.bfloat16), w2_ref[0],
                preferred_element_type=jnp.float32) + b2_ref[0]
    o_ref[0] = x + m                                # residual 2; stays resident across layers


def _weight_spec(arr):
    # Per-layer slab of a stacked (L, ...) weight; indexed by the layer grid axis.
    nd = arr.ndim
    return pl.BlockSpec((1,) + arr.shape[1:],
                        lambda b, l, _nd=nd: (l,) + (0,) * (_nd - 1))


def transformer_forward(x, packed, n_heads):
    """x: (B, S, D) f32; packed: dict of (L, ...) stacked layer params."""
    B, S, D = x.shape
    operands = [packed[k] for k in ("wqkv", "wo", "w1", "b1", "w2", "b2",
                                    "ln1w", "ln1b", "ln2w", "ln2b")]
    L = packed["wqkv"].shape[0]
    kernel = functools.partial(transformer_stack_kernel, n_heads)
    return pl.pallas_call(
        kernel,
        out_shape=jax.ShapeDtypeStruct((B, S, D), jnp.float32),
        grid_spec=pltpu.PrefetchScalarGridSpec(
            num_scalar_prefetch=0,
            grid=(B, L),                           # layer axis last ("arbitrary")
            in_specs=[pl.BlockSpec((1, S, D), lambda b, l: (b, 0, 0))]
                     + [_weight_spec(w) for w in operands],
            out_specs=pl.BlockSpec((1, S, D), lambda b, l: (b, 0, 0)),
        ),
        compiler_params=pltpu.CompilerParams(
            dimension_semantics=("parallel", "arbitrary"),
            vmem_limit_bytes=VMEM_LIMIT_BYTES,
        ),
    )(x, *operands)


# ---------------------------------------------------------------------------
# Parameter construction (mirrors the PyTorch module) + packing for the kernel.
# ---------------------------------------------------------------------------

def init_params(key, n_layers, n_heads, dim):
    """Per-layer params with the same shapes/distributions as the PyTorch module.

    Per-head (D, d_k) Q/K/V weights are generated already concatenated column-wise
    into (D, D) (identical distribution); MLP Linears are stored as (in, out)."""
    del n_heads  # head split is purely a column partition of the (D, D) weights
    params = []
    scale = dim ** (-0.5)                 # MHSA weight scale in the module
    lin_bound = 1.0 / math.sqrt(dim)      # nn.Linear default init bound
    for _ in range(n_layers):
        key, *ks = jax.random.split(key, 9)
        p = dict(
            wq=scale * jax.random.normal(ks[0], (dim, dim), jnp.float32),
            wk=scale * jax.random.normal(ks[1], (dim, dim), jnp.float32),
            wv=scale * jax.random.normal(ks[2], (dim, dim), jnp.float32),
            wo=scale * jax.random.normal(ks[3], (dim, dim), jnp.float32),
            w1=jax.random.uniform(ks[4], (dim, dim), jnp.float32, -lin_bound, lin_bound),
            b1=jax.random.uniform(ks[5], (1, dim), jnp.float32, -lin_bound, lin_bound),
            w2=jax.random.uniform(ks[6], (dim, dim), jnp.float32, -lin_bound, lin_bound),
            b2=jax.random.uniform(ks[7], (1, dim), jnp.float32, -lin_bound, lin_bound),
            ln1w=jnp.ones((1, dim), jnp.float32), ln1b=jnp.zeros((1, dim), jnp.float32),
            ln2w=jnp.ones((1, dim), jnp.float32), ln2b=jnp.zeros((1, dim), jnp.float32),
        )
        params.append(p)
    return params


def pack_params(params, n_heads):
    """Stack layers into (L, ...), fuse QKV (fold 1/sqrt(d_k) into Q), bf16 matmul weights."""
    dim = params[0]["wq"].shape[0]
    inv_sqrt_dk = 1.0 / math.sqrt(dim // n_heads)
    cols = {k: [] for k in ("wqkv", "wo", "w1", "b1", "w2", "b2",
                            "ln1w", "ln1b", "ln2w", "ln2b")}
    for p in params:
        cols["wqkv"].append(
            jnp.concatenate([p["wq"] * inv_sqrt_dk, p["wk"], p["wv"]], axis=1)
            .astype(jnp.bfloat16))
        cols["wo"].append(p["wo"].astype(jnp.bfloat16))
        cols["w1"].append(p["w1"].astype(jnp.bfloat16))
        cols["w2"].append(p["w2"].astype(jnp.bfloat16))
        for k in ("b1", "b2", "ln1w", "ln1b", "ln2w", "ln2b"):
            cols[k].append(p[k])                      # stay f32
    return {k: jnp.stack(v, axis=0) for k, v in cols.items()}


def reference_forward(x, packed, n_heads):
    """Pure-JAX reference with the identical bf16/f32 precision policy."""
    B, S, D = x.shape
    d_k = D // n_heads
    L = packed["wqkv"].shape[0]
    for l in range(L):
        h = _layernorm(x, packed["ln1w"][l], packed["ln1b"][l])
        qkv = jnp.einsum('bsd,de->bse', h.astype(jnp.bfloat16), packed["wqkv"][l],
                         preferred_element_type=jnp.float32).astype(jnp.bfloat16)
        q, k, v = qkv[..., :D], qkv[..., D:2 * D], qkv[..., 2 * D:]
        qh = q.reshape(B, S, n_heads, d_k).transpose(0, 2, 1, 3)
        kh = k.reshape(B, S, n_heads, d_k).transpose(0, 2, 1, 3)
        vh = v.reshape(B, S, n_heads, d_k).transpose(0, 2, 1, 3)
        s = jnp.einsum('bhqd,bhkd->bhqk', qh, kh, preferred_element_type=jnp.float32)
        p = jax.nn.softmax(s, axis=-1)
        ctx = jnp.einsum('bhqk,bhkd->bhqd', p.astype(jnp.bfloat16), vh,
                         preferred_element_type=jnp.float32)
        heads = ctx.astype(jnp.bfloat16).transpose(0, 2, 1, 3).reshape(B, S, D)
        attn = jnp.einsum('bsd,de->bse', heads, packed["wo"][l],
                          preferred_element_type=jnp.float32)
        x = x + attn
        h2 = _layernorm(x, packed["ln2w"][l], packed["ln2b"][l])
        m = jnp.einsum('bsd,de->bse', h2.astype(jnp.bfloat16), packed["w1"][l],
                       preferred_element_type=jnp.float32) + packed["b1"][l]
        m = _gelu_exact(m)
        m = jnp.einsum('bsd,de->bse', m.astype(jnp.bfloat16), packed["w2"][l],
                       preferred_element_type=jnp.float32) + packed["b2"][l]
        x = x + m
    return x


if __name__ == "__main__":
    n_layers, n_heads, dim = 2, 8, 32
    B, S = 2, 8

    key = jax.random.PRNGKey(0)
    kx, kp = jax.random.split(key)
    x = jax.random.normal(kx, (B, S, dim), jnp.float32)
    params = init_params(kp, n_layers, n_heads, dim)
    packed = pack_params(params, n_heads)

    out = transformer_forward(x, packed, n_heads)
    out = jax.block_until_ready(out)
    assert out.shape == (B, S, dim) and out.dtype == jnp.float32

    ref = jax.block_until_ready(reference_forward(x, packed, n_heads))
    max_err = float(jnp.max(jnp.abs(out - ref)))
    assert max_err < 1e-1, f"kernel/reference mismatch: max_err={max_err}"

    print("KERNEL_OK")
</pallas_src>

<mosaic_0001>
module attributes {stable_mosaic.version = 11 : i64} {
  func.func @transformer_stack_kernel(%arg0: i32, %arg1: i32, %arg2: memref<1x8x32xf32, #tpu.memory_space<vmem>>, %arg3: memref<1x32x96xbf16, #tpu.memory_space<vmem>>, %arg4: memref<1x32x32xbf16, #tpu.memory_space<vmem>>, %arg5: memref<1x32x32xbf16, #tpu.memory_space<vmem>>, %arg6: memref<1x1x32xf32, #tpu.memory_space<vmem>>, %arg7: memref<1x32x32xbf16, #tpu.memory_space<vmem>>, %arg8: memref<1x1x32xf32, #tpu.memory_space<vmem>>, %arg9: memref<1x1x32xf32, #tpu.memory_space<vmem>>, %arg10: memref<1x1x32xf32, #tpu.memory_space<vmem>>, %arg11: memref<1x1x32xf32, #tpu.memory_space<vmem>>, %arg12: memref<1x1x32xf32, #tpu.memory_space<vmem>>, %arg13: memref<1x8x32xf32, #tpu.memory_space<vmem>>) attributes {dimension_semantics = [#tpu.dimension_semantics<parallel>, #tpu.dimension_semantics<arbitrary>], iteration_bounds = array<i64: 2, 2>, scalar_prefetch = 0 : i64, scratch_operands = 0 : i64, tpu.core_type = #tpu.core_type<tc>, window_params = [{transform_indices = @transform_0, window_bounds = array<i64: 1, 8, 32>}, {transform_indices = @transform_1, window_bounds = array<i64: 1, 32, 96>}, {transform_indices = @transform_2, window_bounds = array<i64: 1, 32, 32>}, {transform_indices = @transform_3, window_bounds = array<i64: 1, 32, 32>}, {transform_indices = @transform_4, window_bounds = array<i64: 1, 1, 32>}, {transform_indices = @transform_5, window_bounds = array<i64: 1, 32, 32>}, {transform_indices = @transform_6, window_bounds = array<i64: 1, 1, 32>}, {transform_indices = @transform_7, window_bounds = array<i64: 1, 1, 32>}, {transform_indices = @transform_8, window_bounds = array<i64: 1, 1, 32>}, {transform_indices = @transform_9, window_bounds = array<i64: 1, 1, 32>}, {transform_indices = @transform_10, window_bounds = array<i64: 1, 1, 32>}, {transform_indices = @transform_11, window_bounds = array<i64: 1, 8, 32>}]} {
    %c0_i32 = arith.constant 0 : i32
    %0 = arith.cmpi eq, %arg1, %c0_i32 : i32
    %1 = arith.extui %0 : i1 to i32
    %c0_i32_0 = arith.constant 0 : i32
    %2 = arith.cmpi ne, %1, %c0_i32_0 : i32
    scf.if %2 {
      %c0_69 = arith.constant 0 : index
      %c0_70 = arith.constant 0 : index
      %c0_71 = arith.constant 0 : index
      %152 = vector.load %arg2[%c0_69, %c0_70, %c0_71] : memref<1x8x32xf32, #tpu.memory_space<vmem>>, vector<1x8x32xf32>
      %153 = vector.shape_cast %152 : vector<1x8x32xf32> to vector<8x32xf32>
      %c0_72 = arith.constant 0 : index
      %c0_73 = arith.constant 0 : index
      %c0_74 = arith.constant 0 : index
      %154 = vector.load %arg13[%c0_72, %c0_73, %c0_74] : memref<1x8x32xf32, #tpu.memory_space<vmem>>, vector<1x8x32xf32>
      %155 = vector.shape_cast %154 : vector<1x8x32xf32> to vector<8x32xf32>
      %156 = vector.shape_cast %153 : vector<8x32xf32> to vector<1x8x32xf32>
      tpu.vector_store %arg13[%c0_72, %c0_73, %c0_74], %156 {strides = array<i32>} : memref<1x8x32xf32, #tpu.memory_space<vmem>>, vector<1x8x32xf32>,
    } else {
    }
    %c0 = arith.constant 0 : index
    %c0_1 = arith.constant 0 : index
    %c0_2 = arith.constant 0 : index
    %3 = vector.load %arg13[%c0, %c0_1, %c0_2] : memref<1x8x32xf32, #tpu.memory_space<vmem>>, vector<1x8x32xf32>
    %4 = vector.shape_cast %3 : vector<1x8x32xf32> to vector<8x32xf32>
    %c0_3 = arith.constant 0 : index
    %c0_4 = arith.constant 0 : index
    %c0_5 = arith.constant 0 : index
    %5 = vector.load %arg9[%c0_3, %c0_4, %c0_5] : memref<1x1x32xf32, #tpu.memory_space<vmem>>, vector<1x1x32xf32>
    %6 = vector.shape_cast %5 : vector<1x1x32xf32> to vector<1x32xf32>
    %c0_6 = arith.constant 0 : index
    %c0_7 = arith.constant 0 : index
    %c0_8 = arith.constant 0 : index
    %7 = vector.load %arg10[%c0_6, %c0_7, %c0_8] : memref<1x1x32xf32, #tpu.memory_space<vmem>>, vector<1x1x32xf32>
    %8 = vector.shape_cast %7 : vector<1x1x32xf32> to vector<1x32xf32>
    %cst = arith.constant dense<0.000000e+00> : vector<8xf32>
    %9 = vector.multi_reduction <add>, %4, %cst [1] : vector<8x32xf32> to vector<8xf32>
    %10 = vector.shape_cast %9 : vector<8xf32> to vector<8x1xf32>
    %cst_9 = arith.constant 3.200000e+01 : f32
    %11 = vector.broadcast %cst_9 : f32 to vector<8x1xf32>
    %12 = arith.divf %10, %11 : vector<8x1xf32>
    %13 = vector.broadcast %12 : vector<8x1xf32> to vector<8x32xf32>
    %14 = arith.subf %4, %13 : vector<8x32xf32>
    %15 = arith.mulf %14, %14 : vector<8x32xf32>
    %cst_10 = arith.constant dense<0.000000e+00> : vector<8xf32>
    %16 = vector.multi_reduction <add>, %15, %cst_10 [1] : vector<8x32xf32> to vector<8xf32>
    %17 = vector.shape_cast %16 : vector<8xf32> to vector<8x1xf32>
    %cst_11 = arith.constant 3.200000e+01 : f32
    %18 = vector.broadcast %cst_11 : f32 to vector<8x1xf32>
    %19 = arith.divf %17, %18 : vector<8x1xf32>
    %20 = vector.broadcast %12 : vector<8x1xf32> to vector<8x32xf32>
    %21 = arith.subf %4, %20 : vector<8x32xf32>
    %cst_12 = arith.constant 9.99999974E-6 : f32
    %22 = vector.broadcast %cst_12 : f32 to vector<8x1xf32>
    %23 = arith.addf %19, %22 : vector<8x1xf32>
    %24 = math.rsqrt %23 : vector<8x1xf32>
    %25 = vector.broadcast %24 : vector<8x1xf32> to vector<8x32xf32>
    %26 = arith.mulf %21, %25 : vector<8x32xf32>
    %27 = vector.broadcast %6 : vector<1x32xf32> to vector<8x32xf32>
    %28 = arith.mulf %26, %27 : vector<8x32xf32>
    %29 = vector.broadcast %8 : vector<1x32xf32> to vector<8x32xf32>
    %30 = arith.addf %28, %29 : vector<8x32xf32>
    %31 = arith.truncf %30 : vector<8x32xf32> to vector<8x32xbf16>
    %c0_13 = arith.constant 0 : index
    %c0_14 = arith.constant 0 : index
    %c0_15 = arith.constant 0 : index
    %32 = vector.load %arg3[%c0_13, %c0_14, %c0_15] : memref<1x32x96xbf16, #tpu.memory_space<vmem>>, vector<1x32x96xbf16>
    %33 = vector.shape_cast %32 : vector<1x32x96xbf16> to vector<32x96xbf16>
    %cst_16 = arith.constant dense<0.000000e+00> : vector<8x96xf32>
    %34 = tpu.matmul %31, %33, %cst_16 {dimension_numbers = #tpu.dot_dimension_numbers<[1], [0], [0], [1], [0, 0, 1, 1], [], []>} : vector<8x32xbf16>, vector<32x96xbf16>, vector<8x96xf32> -> vector<8x96xf32>
    %35 = arith.truncf %34 : vector<8x96xf32> to vector<8x96xbf16>
    %36 = vector.extract_strided_slice %35 {offsets = [0, 0], sizes = [8, 32], strides = [1, 1]} : vector<8x96xbf16> to vector<8x32xbf16>
    %37 = vector.extract_strided_slice %35 {offsets = [0, 32], sizes = [8, 32], strides = [1, 1]} : vector<8x96xbf16> to vector<8x32xbf16>
    %38 = vector.extract_strided_slice %35 {offsets = [0, 64], sizes = [8, 32], strides = [1, 1]} : vector<8x96xbf16> to vector<8x32xbf16>
    %39 = vector.shape_cast %36 : vector<8x32xbf16> to vector<8x8x4xbf16>
    %40 = tpu.transpose %39, [1, 0, 2] : vector<8x8x4xbf16> -> vector<8x8x4xbf16>
    %41 = vector.shape_cast %37 : vector<8x32xbf16> to vector<8x8x4xbf16>
    %42 = tpu.transpose %41, [1, 0, 2] : vector<8x8x4xbf16> -> vector<8x8x4xbf16>
    %43 = vector.shape_cast %38 : vector<8x32xbf16> to vector<8x8x4xbf16>
    %44 = tpu.transpose %43, [1, 0, 2] : vector<8x8x4xbf16> -> vector<8x8x4xbf16>
    "tpu.trace_start"() <{level = 10 : i32, message = "hqd,hkd->hqk"}> : () -> ()
    %cst_17 = arith.constant dense<0.000000e+00> : vector<8x8x8xf32>
    %45 = tpu.matmul %40, %42, %cst_17 {dimension_numbers = #tpu.dot_dimension_numbers<[2], [2], [1], [1], [0, 0, 0, 1, 1, 1], [0], [0]>} : vector<8x8x4xbf16>, vector<8x8x4xbf16>, vector<8x8x8xf32> -> vector<8x8x8xf32>
    "tpu.trace_stop"() : () -> ()
    %cst_18 = arith.constant dense<0xFF800000> : vector<8x8xf32>
    %46 = vector.multi_reduction <maximumf>, %45, %cst_18 [2] : vector<8x8x8xf32> to vector<8x8xf32>
    %47 = vector.shape_cast %46 : vector<8x8xf32> to vector<8x8x1xf32>
    %48 = vector.broadcast %47 : vector<8x8x1xf32> to vector<8x8x8xf32>
    %49 = arith.subf %45, %48 : vector<8x8x8xf32>
    %50 = math.exp %49 : vector<8x8x8xf32>
    %cst_19 = arith.constant dense<0.000000e+00> : vector<8x8xf32>
    %51 = vector.multi_reduction <add>, %50, %cst_19 [2] : vector<8x8x8xf32> to vector<8x8xf32>
    %52 = vector.shape_cast %51 : vector<8x8xf32> to vector<8x8x1xf32>
    %53 = tpu.reciprocal %52 {approx = true} : vector<8x8x1xf32> -> vector<8x8x1xf32>
    %54 = vector.broadcast %53 : vector<8x8x1xf32> to vector<8x8x8xf32>
    %55 = arith.mulf %50, %54 : vector<8x8x8xf32>
    %56 = arith.truncf %55 : vector<8x8x8xf32> to vector<8x8x8xbf16>
    "tpu.trace_start"() <{level = 10 : i32, message = "hqk,hkd->hqd"}> : () -> ()
    %cst_20 = arith.constant dense<0.000000e+00> : vector<8x8x4xf32>
    %57 = tpu.matmul %56, %44, %cst_20 {dimension_numbers = #tpu.dot_dimension_numbers<[2], [1], [1], [2], [0, 0, 0, 1, 1, 2], [0], [0]>} : vector<8x8x8xbf16>, vector<8x8x4xbf16>, vector<8x8x4xf32> -> vector<8x8x4xf32>
    "tpu.trace_stop"() : () -> ()
    %58 = arith.truncf %57 : vector<8x8x4xf32> to vector<8x8x4xbf16>
    %59 = tpu.transpose %58, [1, 0, 2] : vector<8x8x4xbf16> -> vector<8x8x4xbf16>
    %60 = vector.shape_cast %59 : vector<8x8x4xbf16> to vector<8x32xbf16>
    %c0_21 = arith.constant 0 : index
    %c0_22 = arith.constant 0 : index
    %c0_23 = arith.constant 0 : index
    %61 = vector.load %arg4[%c0_21, %c0_22, %c0_23] : memref<1x32x32xbf16, #tpu.memory_space<vmem>>, vector<1x32x32xbf16>
    %62 = vector.shape_cast %61 : vector<1x32x32xbf16> to vector<32x32xbf16>
    %cst_24 = arith.constant dense<0.000000e+00> : vector<8x32xf32>
    %63 = tpu.matmul %60, %62, %cst_24 {dimension_numbers = #tpu.dot_dimension_numbers<[1], [0], [0], [1], [0, 0, 1, 1], [], []>} : vector<8x32xbf16>, vector<32x32xbf16>, vector<8x32xf32> -> vector<8x32xf32>
    %64 = arith.addf %4, %63 : vector<8x32xf32>
    %c0_25 = arith.constant 0 : index
    %c0_26 = arith.constant 0 : index
    %c0_27 = arith.constant 0 : index
    %65 = vector.load %arg11[%c0_25, %c0_26, %c0_27] : memref<1x1x32xf32, #tpu.memory_space<vmem>>, vector<1x1x32xf32>
    %66 = vector.shape_cast %65 : vector<1x1x32xf32> to vector<1x32xf32>
    %c0_28 = arith.constant 0 : index
    %c0_29 = arith.constant 0 : index
    %c0_30 = arith.constant 0 : index
    %67 = vector.load %arg12[%c0_28, %c0_29, %c0_30] : memref<1x1x32xf32, #tpu.memory_space<vmem>>, vector<1x1x32xf32>
    %68 = vector.shape_cast %67 : vector<1x1x32xf32> to vector<1x32xf32>
    %cst_31 = arith.constant dense<0.000000e+00> : vector<8xf32>
    %69 = vector.multi_reduction <add>, %64, %cst_31 [1] : vector<8x32xf32> to vector<8xf32>
    %70 = vector.shape_cast %69 : vector<8xf32> to vector<8x1xf32>
    %cst_32 = arith.constant 3.200000e+01 : f32
    %71 = vector.broadcast %cst_32 : f32 to vector<8x1xf32>
    %72 = arith.divf %70, %71 : vector<8x1xf32>
    %73 = vector.broadcast %72 : vector<8x1xf32> to vector<8x32xf32>
    %74 = arith.subf %64, %73 : vector<8x32xf32>
    %75 = arith.mulf %74, %74 : vector<8x32xf32>
    %cst_33 = arith.constant dense<0.000000e+00> : vector<8xf32>
    %76 = vector.multi_reduction <add>, %75, %cst_33 [1] : vector<8x32xf32> to vector<8xf32>
    %77 = vector.shape_cast %76 : vector<8xf32> to vector<8x1xf32>
    %cst_34 = arith.constant 3.200000e+01 : f32
    %78 = vector.broadcast %cst_34 : f32 to vector<8x1xf32>
    %79 = arith.divf %77, %78 : vector<8x1xf32>
    %80 = vector.broadcast %72 : vector<8x1xf32> to vector<8x32xf32>
    %81 = arith.subf %64, %80 : vector<8x32xf32>
    %cst_35 = arith.constant 9.99999974E-6 : f32
    %82 = vector.broadcast %cst_35 : f32 to vector<8x1xf32>
    %83 = arith.addf %79, %82 : vector<8x1xf32>
    %84 = math.rsqrt %83 : vector<8x1xf32>
    %85 = vector.broadcast %84 : vector<8x1xf32> to vector<8x32xf32>
    %86 = arith.mulf %81, %85 : vector<8x32xf32>
    %87 = vector.broadcast %66 : vector<1x32xf32> to vector<8x32xf32>
    %88 = arith.mulf %86, %87 : vector<8x32xf32>
    %89 = vector.broadcast %68 : vector<1x32xf32> to vector<8x32xf32>
    %90 = arith.addf %88, %89 : vector<8x32xf32>
    %91 = arith.truncf %90 : vector<8x32xf32> to vector<8x32xbf16>
    %c0_36 = arith.constant 0 : index
    %c0_37 = arith.constant 0 : index
    %c0_38 = arith.constant 0 : index
    %92 = vector.load %arg5[%c0_36, %c0_37, %c0_38] : memref<1x32x32xbf16, #tpu.memory_space<vmem>>, vector<1x32x32xbf16>
    %93 = vector.shape_cast %92 : vector<1x32x32xbf16> to vector<32x32xbf16>
    %cst_39 = arith.constant dense<0.000000e+00> : vector<8x32xf32>
    %94 = tpu.matmul %91, %93, %cst_39 {dimension_numbers = #tpu.dot_dimension_numbers<[1], [0], [0], [1], [0, 0, 1, 1], [], []>} : vector<8x32xbf16>, vector<32x32xbf16>, vector<8x32xf32> -> vector<8x32xf32>
    %c0_40 = arith.constant 0 : index
    %c0_41 = arith.constant 0 : index
    %c0_42 = arith.constant 0 : index
    %95 = vector.load %arg6[%c0_40, %c0_41, %c0_42] : memref<1x1x32xf32, #tpu.memory_space<vmem>>, vector<1x1x32xf32>
    %96 = vector.shape_cast %95 : vector<1x1x32xf32> to vector<1x32xf32>
    %97 = vector.broadcast %96 : vector<1x32xf32> to vector<8x32xf32>
    %98 = arith.addf %94, %97 : vector<8x32xf32>
    %cst_43 = arith.constant 5.000000e-01 : f32
    %99 = vector.broadcast %cst_43 : f32 to vector<8x32xf32>
    %100 = arith.mulf %99, %98 : vector<8x32xf32>
    %cst_44 = arith.constant 0.707106769 : f32
    %101 = vector.broadcast %cst_44 : f32 to vector<8x32xf32>
    %102 = arith.mulf %98, %101 : vector<8x32xf32>
    %cst_45 = arith.constant 0.000000e+00 : f32
    %103 = vector.broadcast %cst_45 : f32 to vector<8x32xf32>
    %104 = arith.cmpf oge, %102, %103 : vector<8x32xf32>
    %cst_46 = arith.constant 1.000000e+00 : f32
    %cst_47 = arith.constant -1.000000e+00 : f32
    %105 = vector.broadcast %cst_46 : f32 to vector<8x32xf32>
    %106 = vector.broadcast %cst_47 : f32 to vector<8x32xf32>
    %107 = arith.select %104, %105, %106 : vector<8x32xi1>, vector<8x32xf32>
    %108 = math.absf %102 : vector<8x32xf32>
    %cst_48 = arith.constant 0.327591091 : f32
    %109 = vector.broadcast %cst_48 : f32 to vector<8x32xf32>
    %110 = arith.mulf %109, %108 : vector<8x32xf32>
    %cst_49 = arith.constant 1.000000e+00 : f32
    %111 = vector.broadcast %cst_49 : f32 to vector<8x32xf32>
    %112 = arith.addf %111, %110 : vector<8x32xf32>
    %cst_50 = arith.constant 1.000000e+00 : f32
    %113 = vector.broadcast %cst_50 : f32 to vector<8x32xf32>
    %114 = arith.divf %113, %112 : vector<8x32xf32>
    %cst_51 = arith.constant 1.06140542 : f32
    %115 = vector.broadcast %cst_51 : f32 to vector<8x32xf32>
    %116 = arith.mulf %115, %114 : vector<8x32xf32>
    %cst_52 = arith.constant -1.45315206 : f32
    %117 = vector.broadcast %cst_52 : f32 to vector<8x32xf32>
    %118 = arith.addf %116, %117 : vector<8x32xf32>
    %119 = arith.mulf %118, %114 : vector<8x32xf32>
    %cst_53 = arith.constant 1.42141378 : f32
    %120 = vector.broadcast %cst_53 : f32 to vector<8x32xf32>
    %121 = arith.addf %119, %120 : vector<8x32xf32>
    %122 = arith.mulf %121, %114 : vector<8x32xf32>
    %cst_54 = arith.constant -0.284496725 : f32
    %123 = vector.broadcast %cst_54 : f32 to vector<8x32xf32>
    %124 = arith.addf %122, %123 : vector<8x32xf32>
    %125 = arith.mulf %124, %114 : vector<8x32xf32>
    %cst_55 = arith.constant 0.254829586 : f32
    %126 = vector.broadcast %cst_55 : f32 to vector<8x32xf32>
    %127 = arith.addf %125, %126 : vector<8x32xf32>
    %128 = arith.mulf %127, %114 : vector<8x32xf32>
    %cst_56 = arith.constant 0.000000e+00 : f32
    %129 = vector.broadcast %cst_56 : f32 to vector<8x32xf32>
    %130 = arith.subf %129, %108 : vector<8x32xf32>
    %131 = arith.mulf %130, %108 : vector<8x32xf32>
    %132 = math.exp %131 : vector<8x32xf32>
    %133 = arith.mulf %128, %132 : vector<8x32xf32>
    %cst_57 = arith.constant 1.000000e+00 : f32
    %134 = vector.broadcast %cst_57 : f32 to vector<8x32xf32>
    %135 = arith.subf %134, %133 : vector<8x32xf32>
    %136 = arith.mulf %107, %135 : vector<8x32xf32>
    %cst_58 = arith.constant 1.000000e+00 : f32
    %137 = vector.broadcast %cst_58 : f32 to vector<8x32xf32>
    %138 = arith.addf %137, %136 : vector<8x32xf32>
    %139 = arith.mulf %100, %138 : vector<8x32xf32>
    %140 = arith.truncf %139 : vector<8x32xf32> to vector<8x32xbf16>
    %c0_59 = arith.constant 0 : index
    %c0_60 = arith.constant 0 : index
    %c0_61 = arith.constant 0 : index
    %141 = vector.load %arg7[%c0_59, %c0_60, %c0_61] : memref<1x32x32xbf16, #tpu.memory_space<vmem>>, vector<1x32x32xbf16>
    %142 = vector.shape_cast %141 : vector<1x32x32xbf16> to vector<32x32xbf16>
    %cst_62 = arith.constant dense<0.000000e+00> : vector<8x32xf32>
    %143 = tpu.matmul %140, %142, %cst_62 {dimension_numbers = #tpu.dot_dimension_numbers<[1], [0], [0], [1], [0, 0, 1, 1], [], []>} : vector<8x32xbf16>, vector<32x32xbf16>, vector<8x32xf32> -> vector<8x32xf32>
    %c0_63 = arith.constant 0 : index
    %c0_64 = arith.constant 0 : index
    %c0_65 = arith.constant 0 : index
    %144 = vector.load %arg8[%c0_63, %c0_64, %c0_65] : memref<1x1x32xf32, #tpu.memory_space<vmem>>, vector<1x1x32xf32>
    %145 = vector.shape_cast %144 : vector<1x1x32xf32> to vector<1x32xf32>
    %146 = vector.broadcast %145 : vector<1x32xf32> to vector<8x32xf32>
    %147 = arith.addf %143, %146 : vector<8x32xf32>
    %148 = arith.addf %64, %147 : vector<8x32xf32>
    %c0_66 = arith.constant 0 : index
    %c0_67 = arith.constant 0 : index
    %c0_68 = arith.constant 0 : index
    %149 = vector.load %arg13[%c0_66, %c0_67, %c0_68] : memref<1x8x32xf32, #tpu.memory_space<vmem>>, vector<1x8x32xf32>
    %150 = vector.shape_cast %149 : vector<1x8x32xf32> to vector<8x32xf32>
    %151 = vector.shape_cast %148 : vector<8x32xf32> to vector<1x8x32xf32>
    tpu.vector_store %arg13[%c0_66, %c0_67, %c0_68], %151 {strides = array<i32>} : memref<1x8x32xf32, #tpu.memory_space<vmem>>, vector<1x8x32xf32>,
    return
  }
  func.func @transform_0(%arg0: i32, %arg1: i32) -> (i32, i32, i32) {
    %c0_i32 = arith.constant 0 : i32
    %c0_i32_0 = arith.constant 0 : i32
    %c0_i32_1 = arith.constant 0 : i32
    return %arg0, %c0_i32, %c0_i32_0 : i32, i32, i32
  }
  func.func @transform_1(%arg0: i32, %arg1: i32) -> (i32, i32, i32) {
    %c0_i32 = arith.constant 0 : i32
    %c0_i32_0 = arith.constant 0 : i32
    %c0_i32_1 = arith.constant 0 : i32
    return %arg1, %c0_i32, %c0_i32_0 : i32, i32, i32
  }
  func.func @transform_2(%arg0: i32, %arg1: i32) -> (i32, i32, i32) {
    %c0_i32 = arith.constant 0 : i32
    %c0_i32_0 = arith.constant 0 : i32
    %c0_i32_1 = arith.constant 0 : i32
    return %arg1, %c0_i32, %c0_i32_0 : i32, i32, i32
  }
  func.func @transform_3(%arg0: i32, %arg1: i32) -> (i32, i32, i32) {
    %c0_i32 = arith.constant 0 : i32
    %c0_i32_0 = arith.constant 0 : i32
    %c0_i32_1 = arith.constant 0 : i32
    return %arg1, %c0_i32, %c0_i32_0 : i32, i32, i32
  }
  func.func @transform_4(%arg0: i32, %arg1: i32) -> (i32, i32, i32) {
    %c0_i32 = arith.constant 0 : i32
    %c0_i32_0 = arith.constant 0 : i32
    %c0_i32_1 = arith.constant 0 : i32
    return %arg1, %c0_i32, %c0_i32_0 : i32, i32, i32
  }
  func.func @transform_5(%arg0: i32, %arg1: i32) -> (i32, i32, i32) {
    %c0_i32 = arith.constant 0 : i32
    %c0_i32_0 = arith.constant 0 : i32
    %c0_i32_1 = arith.constant 0 : i32
    return %arg1, %c0_i32, %c0_i32_0 : i32, i32, i32
  }
  func.func @transform_6(%arg0: i32, %arg1: i32) -> (i32, i32, i32) {
    %c0_i32 = arith.constant 0 : i32
    %c0_i32_0 = arith.constant 0 : i32
    %c0_i32_1 = arith.constant 0 : i32
    return %arg1, %c0_i32, %c0_i32_0 : i32, i32, i32
  }
  func.func @transform_7(%arg0: i32, %arg1: i32) -> (i32, i32, i32) {
    %c0_i32 = arith.constant 0 : i32
    %c0_i32_0 = arith.constant 0 : i32
    %c0_i32_1 = arith.constant 0 : i32
    return %arg1, %c0_i32, %c0_i32_0 : i32, i32, i32
  }
  func.func @transform_8(%arg0: i32, %arg1: i32) -> (i32, i32, i32) {
    %c0_i32 = arith.constant 0 : i32
    %c0_i32_0 = arith.constant 0 : i32
    %c0_i32_1 = arith.constant 0 : i32
    return %arg1, %c0_i32, %c0_i32_0 : i32, i32, i32
  }
  func.func @transform_9(%arg0: i32, %arg1: i32) -> (i32, i32, i32) {
    %c0_i32 = arith.constant 0 : i32
    %c0_i32_0 = arith.constant 0 : i32
    %c0_i32_1 = arith.constant 0 : i32
    return %arg1, %c0_i32, %c0_i32_0 : i32, i32, i32
  }
  func.func @transform_10(%arg0: i32, %arg1: i32) -> (i32, i32, i32) {
    %c0_i32 = arith.constant 0 : i32
    %c0_i32_0 = arith.constant 0 : i32
    %c0_i32_1 = arith.constant 0 : i32
    return %arg1, %c0_i32, %c0_i32_0 : i32, i32, i32
  }
  func.func @transform_11(%arg0: i32, %arg1: i32) -> (i32, i32, i32) {
    %c0_i32 = arith.constant 0 : i32
    %c0_i32_0 = arith.constant 0 : i32
    %c0_i32_1 = arith.constant 0 : i32
    return %arg0, %c0_i32, %c0_i32_0 : i32, i32, i32
  }
}

</mosaic_0001>

<bundles_post_ra>
// kernel: tpu_custom_call.1
= control target key start
LH: loop header
LB: loop body
LE: loop exit
PB: predicated region body
PF: predicated region fallthrough
CT: control target
= control target key end

     0   :  { %s3916_s0 = inlined_call_operand.hbm [shape: f32[2,8,32], index: 0, kind: input, shape index: {}]   ;;  %s3917_s1 = inlined_call_operand.hbm [shape: bf16[2,32,96], index: 1, kind: input, shape index: {}]   ;;  %s3918_s2 = inlined_call_operand.hbm [shape: bf16[2,32,32], index: 2, kind: input, shape index: {}]   ;;  %s3919_s3 = inlined_call_operand.hbm [shape: bf16[2,32,32], index: 3, kind: input, shape index: {}]   ;;  %s3920_s4 = inlined_call_operand.vmem [shape: f32[2,1,32], index: 4, kind: input, shape index: {}]   ;;  %s3921_s5 = inlined_call_operand.hbm [shape: bf16[2,32,32], index: 5, kind: input, shape index: {}]   ;;  %s3922_s6 = inlined_call_operand.vmem [shape: f32[2,1,32], index: 6, kind: input, shape index: {}]   ;;  %s3923_s7 = inlined_call_operand.vmem [shape: f32[2,1,32], index: 7, kind: input, shape index: {}]   ;;  %s3924_s8 = inlined_call_operand.hbm [shape: f32[2,1,32], index: 8, kind: input, shape index: {}]   ;;  %s3925_s9 = inlined_call_operand.vmem [shape: f32[2,1,32], index: 9, kind: input, shape index: {}]   ;;  %s3926_s10 = inlined_call_operand.hbm [shape: f32[2,1,32], index: 10, kind: input, shape index: {}]   ;;  %s3927_s11 = inlined_call_operand.hbm [shape: f32[2,8,32], index: 11, kind: output, shape index: {}]  }
   0x1   :  { %3946 = sst [smem:[#allocation32_spill]] %s3916_s0 }
   0x2   :  { %3947 = sst [smem:[#allocation33_spill]] %s3917_s1 }
   0x3   :  { %3948 = sst [smem:[#allocation34_spill]] %s3918_s2 }
   0x4   :  { %3949 = sst [smem:[#allocation35_spill]] %s3919_s3 }
   0x5   :  { %3950 = sst [smem:[#allocation36_spill]] %s3920_s4 }
   0x6   :  { %3951 = sst [smem:[#allocation37_spill]] %s3921_s5 }
   0x7   :  { %3952 = sst [smem:[#allocation38_spill]] %s3922_s6 }
   0x8   :  { %3953 = sst [smem:[#allocation39_spill]] %s3923_s7 }
   0x9   :  { %3954 = sst [smem:[#allocation40_spill]] %s3924_s8 }
   0xa   :  { %3955 = sst [smem:[#allocation41_spill]] %s3925_s9 }
   0xb   :  { %3956 = sst [smem:[#allocation42_spill]] %s3927_s11 }
   0xc   :  { %16 = vsyncpa [#allocation3], 0 }
   0xd   :  { %18 = vsyncpa [#allocation3 + $0x1], 0 }
   0xe   :  { %19 = vsyncpa [#allocation6], 0 }
   0xf   :  { %21 = vsyncpa [#allocation6 + $0x1], 0 }
  0x10   :  { %22 = vsyncpa [#allocation9], 0 }
  0x11   :  { %24 = vsyncpa [#allocation9 + $0x1], 0 }
  0x12   :  { %25 = vsyncpa [#allocation12], 0 }
  0x13   :  { %27 = vsyncpa [#allocation12 + $0x1], 0 }
  0x14   :  { %28 = vsyncpa [#allocation4], 0 }
  0x15   :  { %30 = vsyncpa [#allocation4 + $0x1], 0  ;;  %s3145_s17 = smov 0   ;;  %s3147_s18 = smov 0  }
  0x16   :  { %s3149_s19 = smov 0   ;;  %s3151_s20 = smov 0  }
  0x17   :  { %s3153_s21 = smov 0   ;;  %s3155_s22 = smov 0  }
  0x18   :  { %s3157_s23 = smov 0   ;;  %s3159_s24 = smov 0  }
  0x19   :  { %s3161_s25 = smov 0   ;;  %s3163_s26 = smov 0  }
  0x1a   :  { %s3165_s27 = smov 0  }
  0x1b LB: > { %3957 = sst [smem:[#allocation20_spill]] %s3029_s19  ;;  %p63_p0 = scmp.eq.s32.totalorder %s3061_s27, 0  ;;  %s3061_s27 = sphi %s3165_s27, %s36_s27   ;;  %s3057_s26 = sphi %s3163_s26, %s4018_s26   ;;  %s3053_s25 = sphi %s3161_s25, %s4024_s25   ;;  %s3049_s24 = sphi %s3159_s24, %s4016_s24   ;;  %s3045_s23 = sphi %s3157_s23, %s4023_s23   ;;  %s3041_s22 = sphi %s3155_s22, %s4015_s22   ;;  %s3037_s21 = sphi %s3153_s21, %s4022_s21   ;;  %s3033_s20 = sphi %s3151_s20, %s4021_s20   ;;  %s3029_s19 = sphi %s3149_s19, %s4013_s19   ;;  %s3025_s18 = sphi %s3147_s18, %s4020_s18   ;;  %s3021_s17 = sphi %s3145_s17, %s4019_s17  }
  0x1c   : > { %3958 = sst [smem:[#allocation21_spill]] %s3033_s20  ;;  %p88_p1 = scmp.ne.s32.totalorder %s3029_s19, %s3025_s18 }
  0x1d   : > { %3959 = sst [smem:[#allocation22_spill]] %s3041_s22  ;;  %p3938_p2 = scmp.lt.s32.totalorder %s3061_s27, 4 }
  0x1e   : > { %3960 = sst [smem:[#allocation23_spill]] %s3045_s23  ;;  %s3206_s29 = sand.u32 1, %s3061_s27  }
  0x1f   : > { %3961 = sst [smem:[#allocation24_spill]] %s3049_s24  ;;  %p90_p3 = por %p88_p1, %p63_p0 }
  0x20   : > { %3962 = sst [smem:[#allocation25_spill]] %s3057_s26  ;;  %s3211_s30 = sand.u32 1, %s3029_s19  }
  0x21   : > { %s3214_s12 = sshll.u32 %s3053_s25, 4  ;;  %s3217_s13 = sshll.u32 %s3211_s30, 4 }
  0x22   : > { %s3963_s1 = sld [smem:[#allocation33_spill]]  ;;  %s401_s11 = scalar_lea.vmem [#allocation5], %s3217_s13 }
  0x23   : > { %s409_s24 = sshll.u32 %s401_s11, 4  ;;  %p3226_p4 = pnand %p3938_p2, %p90_p3  ;;  %s410_s24 = int_to_ptr.vmem [resolvable:$true] %s409_s24 }
  0x24   : > { %p2438_p5 = scmp.ge.s32.totalorder %s3061_s27, 1  ;;  %s3930_s14 = scalar_lea.sflag [#allocation6], %s3206_s29 }
  0x25   : > { %s3934_s15 = smov 64   ;;  %p541_p6 = scmp.lt.s32.totalorder %s3061_s27, 5 }
  0x26   : > { %s3965_s3 = sld [smem:[#allocation35_spill]]  ;;  %s445_s23 = scalar_lea.vmem [#allocation8], %s3217_s13 }
  0x27   : > { %p3244_p7 = pnand %p2438_p5, %p541_p6  ;;  %s3968_s8 = sld [smem:[#allocation40_spill]] }
  0x28   : > { %s406_s16 = scalar_lea.hbm %s3963_s1, %s3214_s12  ;;  %s45_s1 = sadd.s32 1, %s3053_s25 }
  0x29   : > { %s407_s28 = sshll.u32 %s406_s16, 4  ;;  %s3936_s16 = smov 4   ;;  %s408_s28 = int_to_ptr.hbm [resolvable:$true] %s407_s28 }
  0x2a   : > { %2536 = dma.hbm_to_vmem [thread:$0]  (!%p3226_p4), %s408_s28, 256, %s410_s24, %s3930_s14, %s3934_s15, %s3934_s15, %s3936_s16  }
  0x2b   : > { %s3966_s6 = scalar_select %p3244_p7, 1, 0 }
  0x2c   : > { %s450_s7 = scalar_lea.hbm %s3965_s3, %s3214_s12  ;;  %s453_s24 = sshll.u32 %s445_s23, 4  ;;  %s454_s24 = int_to_ptr.vmem [resolvable:$true] %s453_s24 }
  0x2d   : > { %3967 = sst [smem:[#allocation26_spill]] %s3966_s6  ;;  %s451_s4 = sshll.u32 %s450_s7, 4  ;;  %s452_s4 = int_to_ptr.hbm [resolvable:$true] %s451_s4 }
  0x2e   : > { %s3933_s28 = scalar_lea.sflag [#allocation9], %s3206_s29  ;;  %s509_s7 = scalar_lea.hbm %s3968_s8, %s3053_s25 }
  0x2f   : > { %2542 = dma.hbm_to_vmem [thread:$0]  (!%p3226_p4), %s452_s4, 256, %s454_s24, %s3933_s28, %s3934_s15, %s3934_s15, %s3936_s16  }
  0x30   : > { %s511_s14 = sshll.u32 %s509_s7, 4  ;;  %s506_s23 = scalar_lea.vmem [#allocation11], %s3211_s30  ;;  %s512_s14 = int_to_ptr.hbm [resolvable:$true] %s511_s14 }
  0x31   : > { %s513_s3 = sshll.u32 %s506_s23, 4  ;;  %s3932_s6 = scalar_lea.sflag [#allocation12], %s3206_s29  ;;  %s514_s3 = int_to_ptr.vmem [resolvable:$true] %s513_s3 }
  0x32   : > { %2548 = dma.hbm_to_vmem [thread:$0]  (!%p3226_p4), %s512_s14, 16, %s514_s3, %s3932_s6  }
  0x33   : > { %s3268_s4 = sadd.s32 4294967295, %s3061_s27   ;;  %s2421_s24 = sadd.s32 4294967294, %s3061_s27  }
  0x34   : > { %s48_s11 = sadd.s32 1, %s3057_s26  ;;  %p46_p8 = scmp.ge.s32.totalorder %s45_s1, 2 }
  0x35   : > { %s55_s7 = sadd.s32 1, %s3041_s22  ;;  %p62_p9 = scmp.ne.s32.totalorder %s3041_s22, %s3037_s21 }
  0x36   : > { %p68_p10 = scmp.ne.s32.totalorder %s3037_s21, %s3033_s20  ;;  %s4026_s1 = smov (%p46_p8, %s45_s1), 0 }
  0x37   : > { %3969 = sst [smem:[#allocation27_spill]] %s4026_s1  ;;  %s4028_s11 = smov (!%p46_p8, %s48_s11), %s3057_s26 }
  0x38   : > { %p3286_p11 = por %p63_p0, %p62_p9  ;;  %p69_p12 = scmp.eq.s32.totalorder %s3268_s4, 0 }
  0x39   : > { %p50_p13 = scmp.ge.s32.totalorder %s4028_s11, 2  ;;  %s78_s14 = ssub.s32 %s3053_s25, %s4026_s1 }
  0x3a   : > { %p3296_p1 = por %p69_p12, %p68_p10  ;;  %p79_p3 = scmp.eq.s32.totalorder %s78_s14, 0 }
  0x3b   : > { %s4030_s11 = smov (%p50_p13, %s4028_s11), 0  ;;  %s3973_s6 = sadd.s32 1, %s3029_s19 }
  0x3c   : > { %3972 = sst [smem:[#allocation28_spill]] %s4030_s11  ;;  %s52_s15 = ssub.s32 %s3057_s26, %s4030_s11 }
  0x3d   : > { %s3305_s28 = scalar_select %p79_p3, %s3029_s19, %s3973_s6  }
  0x3e   : > { %p94_p0 = scmp.ne.s32.totalorder %s3025_s18, %s3021_s17  ;;  %p53_p5 = scmp.eq.s32.totalorder %s52_s15, 0 }
  0x3f   : > { %3974 = sst [smem:[#allocation29_spill]] %s3305_s28  ;;  %p352_p6 = scmp.eq.s32.totalorder %s3268_s4, 3 }
  0x40   : > { %p3312_p8 = por %p94_p0, %p69_p12  ;;  %p358_p2 = scmp.eq.s32.totalorder %s2421_s24, 3 }
  0x41   : > { %s3317_s14 = scalar_select %p53_p5, %s3041_s22, %s55_s7  }
  0x42   : > { %p3322_p13 = por %p352_p6, %p62_p9  ;;  %p3329_p3 = por %p358_p2, %p68_p10 }
  0x43   : > { %3976 = sst [smem:[#allocation30_spill]] %s3317_s14  ;;  %s378_s17 = sand.u32 1, %s3041_s22  }
  0x44   : > { %s3978_s6 = scalar_select %p3329_p3, 1, 0 }
  0x45   : > { %s2425_s15 = sshll.u32 %s3057_s26, 3  ;;  %s2424_s11 = sshll.u32 %s378_s17, 3 }
  0x46   : > { %3979 = sst [smem:[#allocation31_spill]] %s3978_s6  ;;  %s382_s14 = scalar_lea.vmem [#allocation2], %s2424_s11 }
  0x47   : > { %s3980_s0 = sld [smem:[#allocation32_spill]]  ;;  %s390_s19 = sshll.u32 %s382_s14, 4  ;;  %s391_s19 = int_to_ptr.vmem [resolvable:$true] %s390_s19 }
  0x48   : > { %p3981_p2 = scmp.lt.s32.totalorder %s3061_s27, 4  ;;  %s3982_s2 = sld [smem:[#allocation34_spill]] }
  0x49   : > { %s423_s28 = scalar_lea.vmem [#allocation7], %s3217_s13  ;;  %s3983_s11 = smov 4  }
  0x4a   : > { %p2531_p9 = pnand %p3981_p2, %p3286_p11  ;;  %s431_s1 = sshll.u32 %s423_s28, 4  ;;  %s432_s1 = int_to_ptr.vmem [resolvable:$true] %s431_s1 }
  0x4b   : > { %s3984_s3 = smov 64   ;;  %s3985_s14 = scalar_lea.sflag [#allocation6], %s3206_s29 }
  0x4c   : > { %s3986_s5 = sld [smem:[#allocation37_spill]]  ;;  %s473_s28 = scalar_lea.vmem [#allocation10], %s3217_s13 }
  0x4d   : > { %s386_s24 = scalar_lea.hbm %s3980_s0, %s2425_s15  ;;  %s481_s20 = sshll.u32 %s473_s28, 4  ;;  %s482_s20 = int_to_ptr.vmem [resolvable:$true] %s481_s20 }
  0x4e   : > { %s388_s7 = sshll.u32 %s386_s24, 4  ;;  %s428_s26 = scalar_lea.hbm %s3982_s2, %s3214_s12  ;;  %s389_s7 = int_to_ptr.hbm [resolvable:$true] %s388_s7 }
  0x4f   : > { %s429_s15 = sshll.u32 %s428_s26, 4  ;;  %s379_s24 = scalar_lea.sflag [#allocation3], %s378_s17  ;;  %s430_s15 = int_to_ptr.hbm [resolvable:$true] %s429_s15 }
  0x50   : > { %2533 = dma.hbm_to_vmem [thread:$0]  (!%p2531_p9), %s389_s7, 128, %s391_s19, %s379_s24  }
  0x51   : > { %2539 = dma.hbm_to_vmem [thread:$0]  (!%p3226_p4), %s430_s15, 256, %s432_s1, %s3985_s14, %s3984_s3, %s3984_s3, %s3983_s11  }
  0x52   : > { %s478_s0 = scalar_lea.hbm %s3986_s5, %s3214_s12  ;;  %s3987_s19 = scalar_lea.sflag [#allocation9], %s3206_s29 }
  0x53   : > { %s479_s2 = sshll.u32 %s478_s0, 4  ;;  %s532_s7 = scalar_lea.hbm %s3926_s10, %s3053_s25  ;;  %s480_s2 = int_to_ptr.hbm [resolvable:$true] %s479_s2 }
  0x54   : > { %2545 = dma.hbm_to_vmem [thread:$0]  (!%p3226_p4), %s480_s2, 256, %s482_s20, %s3987_s19, %s3984_s3, %s3984_s3, %s3983_s11  }
  0x55   : > { %s534_s1 = sshll.u32 %s532_s7, 4  ;;  %s529_s15 = scalar_lea.vmem [#allocation13], %s3211_s30  ;;  %s535_s1 = int_to_ptr.hbm [resolvable:$true] %s534_s1 }
  0x56   : > { %s536_s24 = sshll.u32 %s529_s15, 4  ;;  %s3988_s0 = scalar_lea.sflag [#allocation12], %s3206_s29  ;;  %s537_s24 = int_to_ptr.vmem [resolvable:$true] %s536_s24 }
  0x57   : > { %2551 = dma.hbm_to_vmem [thread:$0]  (!%p3226_p4), %s535_s1, 16, %s537_s24, %s3988_s0  }
  0x58   : > { %545 = sbr.rel (%p3244_p7) target bundleno = 2232 (0x8b8), region = 64  ;;  %s3378_s13 = sand.u32 (!%p3244_p7), 1, %s3037_s21  }
  0x59   : > { %s2439_s2 = sshll.u32 (!%p3244_p7), %s3378_s13, 3  ;;  %s548_s20 = scalar_lea.sflag (!%p3244_p7), [#allocation3], %s3378_s13 }
  0x5a   : > { %s551_s11 = scalar_lea.vmem (!%p3244_p7), [#allocation2], %s2439_s2 }
  0x5d   : > { %3000 = dma.done.wait (%p3296_p1), %s548_s20, 128  }
  0x5e   : > { %3002 = vsyncadd (%p3296_p1), %s548_s20, 4294967168  ;;  %s557_s9 = sand.u32 1, %s3268_s4   ;;  %s3388_s29 = sand.u32 1, %s3025_s18  }
  0x5f   : > { %s3391_s30 = sshll.u32 %s3388_s29, 4  ;;  %s558_s3 = scalar_lea.sflag [#allocation6], %s557_s9 }
  0x60   : > { %3004 = dma.done.wait (%p3312_p8), %s558_s3, 512  }
  0x61   : > { %3006 = vsyncadd (%p3312_p8), %s558_s3, 4294966784  ;;  %s578_s22 = scalar_lea.sflag [#allocation9], %s557_s9 }
  0x62   : > { %3008 = dma.done.wait (%p3312_p8), %s578_s22, 512  }
  0x63   : > { %3010 = vsyncadd (%p3312_p8), %s578_s22, 4294966784  ;;  %s598_s28 = scalar_lea.sflag [#allocation12], %s557_s9 }
  0x64   : > { %3012 = dma.done.wait (%p3312_p8), %s598_s28, 32  }
  0x65   : > { %3014 = vsyncadd (%p3312_p8), %s598_s28, 4294967264  ;;  %s3990_s26 = sld [smem:[#allocation23_spill]]  ;;  %s609_s14 = scalar_lea.vmem [#allocation13], %s3388_s29 }
  0x66   : > { %s3991_s15 = sld [smem:[#allocation36_spill]]  ;;  %s3431_s5 = scalar_lea.vmem [#allocation14], %s2439_s2 }
  0x67   : > { %s3992_s20 = sld [smem:[#allocation38_spill]] }
  0x68   : > { %s3993_s22 = sld [smem:[#allocation39_spill]] }
  0x69   : > { %s3994_s23 = sld [smem:[#allocation41_spill]] }
  0x6b   : > { %p689_p4 = scmp.lt.s32.totalorder %s3990_s26, 1  ;;  %p2445_p7 = scmp.ne.s32.totalorder %s3990_s26, 0 }
  0x6d   : > { %s3412_s17 = scalar_select %p689_p4, %s3990_s26, 1 }
  0x6e   : > { %705 = sbr.rel (%p2445_p7) target bundleno = 117 (0x75), region = 96 }
  0x6f   : > { %s691_s24 = scalar_lea.vmem %s3991_s15, %s3412_s17  ;;  %s694_s9 = scalar_lea.vmem %s3992_s20, %s3412_s17 }
  0x70   : > { %s697_s28 = scalar_lea.vmem %s3993_s22, %s3412_s17  ;;  %s700_s19 = scalar_lea.vmem %s3994_s23, %s3412_s17 }
  0x73   : > { %v706_v0 = vld [vmem:[%s551_s11] sm:$0xff]  ;;  %vm707_vm0 = vcmask 261120  }
  0x74   : > { %708 = vst.msk [vmem:[%s3431_s5] sm:$0xff] %vm707_vm0, %v706_v0 }
  0x75 PF: > { %vm712_vm1 = vcmask 261120   ;;  %v3065_v3 = vmov 32.0   ;;  %s3995_s2 = scalar_lea.vmem [#allocation5], %s3391_s30  ;;  %v2668_v26 = vld [vmem:[%s697_s28] ss:$0 sm:$0xff]  ;;  %s3998_s26 = scalar_lea.vmem [#allocation11], %s3388_s29 }
  0x76   : > { %2674 = vrcp.f32 %v3065_v3  ;;  %v2507_v15 = vld [vmem:[%s3995_s2 + $0x8] sm:$0xff]  ;;  %s3996_s11 = smov %s3995_s2  ;;  %v2669_v29 = vld [vmem:[%s3998_s26] ss:$0 sm:$0xff]  ;;  %s3066_s7 = smov 100   ;;  %v3074_v40 = vmov 1983009808  }
  0x77   : > { %776 = vmatpush.bf16.msra.mxu0 %v2507_v15  ;;  %v2506_v16 = vld [vmem:[%s3996_s11] sm:$0xff]  ;;  %s3067_s1 = smov 124   ;;  %s3068_s15 = smov 112   ;;  %v810_v41 = vunpack.c.l.s4 %v3074_v40  ;;  %vm807_vm6 = vcmask 1047556   ;;  %v3076_v48 = vmov 1934713408  }
  0x78   : > { %s3069_s0 = smov 104   ;;  %s3070_s12 = smov 108   ;;  %v824_v49 = vunpack.c.l.s4 %v3076_v48  ;;  %vm1359_vm7 = vcmask 31744   ;;  %vm1512_vm8 = vcmask 64512   ;;  %vm1612_vm9 = vcmask 1043456  }
  0x79   : > { %s3071_s20 = smov 116   ;;  %s3072_s16 = smov 120   ;;  %v3468_v44 = vunpack.c.0.s8 %v810_v41  ;;  %vm1971_vm10 = vcmask 97280   ;;  %vm1974_vm11 = vcmask 130048   ;;  %vm1977_vm12 = vcmask 162816  }
  0x7a   : > { %s3073_s3 = smov 96   ;;  %s3075_s22 = smov 64   ;;  %v3483_v55 = vunpack.c.0.s8 %v824_v49  ;;  %vm1980_vm13 = vcmask 195584   ;;  %vm1983_vm14 = vcmask 228352  }
  0x7b   : > { %v709_v1 = vld [vmem:[%s3431_s5] sm:$0xff]  ;;  %777 = vmatpush.bf16.msra.mxu0 %v2506_v16  ;;  %s3077_s28 = smov 16   ;;  %s3078_s2 = smov 4  }
  0x7c   : > { %v713_v2 = vsel %vm712_vm1, %v709_v1, 0.0  ;;  %v2675_v4 = vpop.eup %2674  ;;  %s3079_s11 = smov 12   ;;  %s3080_s23 = smov 8  }
  0x7d   : > { %714 = vadd.xlane.f32.xlu0 %v713_v2  ;;  %v717_v5 = vmul.f32 32.0, %v2675_v4  ;;  %vm721_vm2 = vweird.f32 %v2675_v4  ;;  %s3081_s6 = smov 20   ;;  %s3082_s4 = smov 24  }
  0x7e   : > { %s3083_s26 = smov 28   ;;  %s4005_s29 = scalar_lea.vmem [#allocation10], %s3391_s30 }
  0x7f   : > { %v718_v6 = vsub.f32 1.0, %v717_v5 }
  0x81   : > { %v719_v7 = vmul.f32 %v2675_v4, %v718_v6 }
  0x83   : > { %v720_v8 = vadd.f32 %v2675_v4, %v719_v7 }
  0x85   : > { %v3437_v9 = vsel %vm721_vm2, %v2675_v4, %v720_v8 }
  0xf0   : > { %v715_v10 = vpop.xlane.xlu0 %714 }
  0xf1   : > { %v723_v11 = vmul.f32 %v3437_v9, %v715_v10 }
  0xf3   : > { %v724_v12 = vsub.f32 %v709_v1, %v723_v11 }
  0xf5   : > { %v725_v13 = vmul.f32 %v724_v12, %v724_v12 }
  0xf7   : > { %v726_v14 = vsel %vm712_vm1, %v725_v13, 0.0 }
  0xf8   : > { %727 = vadd.xlane.f32.xlu0 %v726_v14 }
 0x16b   : > { %v728_v17 = vpop.xlane.xlu0 %727 }
 0x16c   : > { %v729_v18 = vmul.f32 %v728_v17, %v3437_v9 }
 0x16e   : > { %v730_v19 = vadd.f32 1e-05, %v729_v18 }
 0x170   : > { %2676 = vrsqrt.f32 %v730_v19  ;;  %vm737_vm4 = vweird.f32 %v730_v19 }
 0x176   : > { %v2677_v20 = vpop.eup %2676 }
 0x177   : > { %v732_v21 = vmul.f32 %v2677_v20, %v730_v19  ;;  %vm738_vm3 = vweird.f32 %v2677_v20 }
 0x178   : > { %vm739_vm5 = vmor %vm737_vm4, %vm738_vm3 }
 0x179   : > { %v733_v22 = vmul.f32 %v2677_v20, %v732_v21 }
 0x17b   : > { %v734_v23 = vmul.f32 0.5, %v733_v22 }
 0x17d   : > { %v735_v24 = vsub.f32 1.5, %v734_v23 }
 0x17f   : > { %v736_v25 = vmul.f32 %v2677_v20, %v735_v24 }
 0x181   : > { %v740_v27 = vsel %vm739_vm5, %v2677_v20, %v736_v25 }
 0x182   : > { %v741_v28 = vmul.f32 %v740_v27, %v724_v12 }
 0x184   : > { %v745_v30 = vmul.f32 %v2668_v26, %v741_v28 }
 0x186   : > { %v749_v31 = vadd.f32 %v2669_v29, %v745_v30 }
 0x188   : > { %v750_v32 = vpack.c.bf16 %v749_v31, %v749_v31 }
 0x18a   : > { %2454 = vmatmul.msk.bf16.vlgmr.msra.gmra.mxu0 %vm712_vm1, %v750_v32 }
 0x207   : > { %v779_v33 = vpop.f32.mrf.mxu0 }
 0x208   : > { %v783_v34 = vpack.c.bf16 %v779_v33, %v779_v33 }
 0x20a   : > { %803 = vrot.lane.b32.xlu0 %v783_v34, %s3066_s7  ;;  %785 = vrot.lane.b32.xlu2 %v783_v34, %s3067_s1  ;;  %s3999_s7 = scalar_lea.vmem [#allocation7], %s3391_s30 }
 0x20b   : > { %794 = vrot.lane.b32.xlu1 %v783_v34, %s3068_s15  ;;  %s4000_s1 = smov %s3999_s7  ;;  %s4001_s15 = scalar_lea.vmem [#allocation8], %s3391_s30 }
 0x20f   : > { %v781_v35 = vpop.f32.mrf.mxu0 }
 0x212   : > { %800 = vrot.lane.b32.xlu2 %v783_v34, %s3069_s0  ;;  %s4002_s0 = smov %s4001_s15 }
 0x213   : > { %797 = vrot.lane.b32.xlu1 %v783_v34, %s3070_s12 }
 0x21a   : > { %791 = vrot.lane.b32.xlu2 %v783_v34, %s3071_s20 }
 0x21b   : > { %788 = vrot.lane.b32.xlu1 %v783_v34, %s3072_s16 }
 0x223   : > { %975 = vrot.lane.b32.xlu1 %v783_v34, %s3073_s3 }
 0x264   : > { %v786_v36 = vpop.permute.xlu2 %785 }
 0x26c   : > { %v3455_v37 = vpop.permute.xlu2 %800 }
 0x26d   : > { %987 = vrot.lane.b32.xlu0 %v3455_v37, %s3073_s3  ;;  %v813_v60 = vrot.slane %v3455_v37, 4 }
 0x274   : > { %v3459_v38 = vpop.permute.xlu2 %791 }
 0x275   : > { %981 = vrot.lane.b32.xlu0 %v3459_v38, %s3073_s3 }
 0x27c   : > { %v3463_v39 = vpop.permute.xlu0 %803 }
 0x27d   : > { %v795_v42 = vpop.permute.xlu1 %794  ;;  %v841_v43 = vrot.slane %v3463_v39, 4 }
 0x27e   : > { %1175 = vrot.lane.b32.xlu0 %v795_v42, %s3075_s22  ;;  %983 = vrot.lane.b32.xlu1 %v795_v42, %s3073_s3  ;;  %v806_v46 = vrot.slane %v795_v42, 4 }
 0x27f   : > { %v842_v45 = vsel %vm807_vm6, %v841_v43, %v3459_v38 }
 0x280   : > { %v846_v47 = vperm.slane %v842_v45, %v3468_v44  ;;  %v808_v52 = vsel %vm807_vm6, %v806_v46, %v783_v34 }
 0x281   : > { %v812_v57 = vperm.slane %v808_v52, %v3468_v44 }
 0x282   : > { %v847_v54 = vrot.slane %v846_v47, 4 }
 0x283   : > { %v821_v2 = vrot.slane %v812_v57, 4 }
 0x285   : > { %v3473_v50 = vpop.permute.xlu1 %797 }
 0x286   : > { %v835_v51 = vrot.slane %v3473_v50, 4  ;;  %1169 = vrot.lane.b32.xlu0 %v786_v36, %s3075_s22  ;;  %989 = vrot.lane.b32.xlu1 %v3463_v39, %s3073_s3 }
 0x287   : > { %985 = vrot.lane.b32.xlu2 %v3473_v50, %s3073_s3 }
 0x288   : > { %v836_v53 = vsel %vm807_vm6, %v835_v51, %v786_v36 }
 0x289   : > { %v840_v56 = vperm.slane %v836_v53, %v3468_v44 }
 0x28b   : > { %v848_v58 = vsel %vm807_vm6, %v847_v54, %v840_v56  ;;  %v849_v59 = vrot.slane %v840_v56, 4 }
 0x28c   : > { %v854_v62 = vperm.slane %v848_v58, %v3483_v55 }
 0x28d   : > { %v850_v61 = vsel %vm807_vm6, %v846_v47, %v849_v59  ;;  %v3491_v63 = vpop.permute.xlu1 %788 }
 0x28e   : > { %v858_v0 = vperm.slane %v850_v61, %v3483_v55  ;;  %v814_v1 = vsel %vm807_vm6, %v813_v60, %v3491_v63  ;;  %1167 = vrot.lane.b32.xlu1 %v783_v34, %s3075_s22  ;;  %v859_v5 = vrot.slane %v854_v62, 4  ;;  %v868_v16 = vshrl.u32 %v854_v62, 16 }
 0x28f   : > { %v818_v3 = vperm.slane %v814_v1, %v3468_v44  ;;  %977 = vrot.lane.b32.xlu2 %v786_v36, %s3073_s3 }
 0x290   : > { %v861_v4 = vrot.slane %v858_v0, 4  ;;  %v860_v17 = vsel %vm807_vm6, 0, %v859_v5  ;;  %v884_v18 = vshrl.u32 %v858_v0, 16 }
 0x291   : > { %v819_v6 = vrot.slane %v818_v3, 4  ;;  %v822_v7 = vsel %vm807_vm6, %v818_v3, %v821_v2  ;;  %v876_v28 = vshrl.u32 %v860_v17, 16 }
 0x292   : > { %v862_v8 = vsel %vm807_vm6, 0, %v861_v4  ;;  %v830_v10 = vperm.slane %v822_v7, %v3483_v55 }
 0x293   : > { %v820_v11 = vsel %vm807_vm6, %v819_v6, %v812_v57  ;;  %v892_v19 = vshrl.u32 %v862_v8, 16 }
 0x294   : > { %v826_v12 = vperm.slane %v820_v11, %v3483_v55  ;;  %v833_v13 = vrot.slane %v830_v10, 4  ;;  %v881_v14 = vpack.i.b16 %v858_v0, %v830_v10  ;;  %v883_v15 = vshrl.u32 %v830_v10, 16 }
 0x296   : > { %v831_v20 = vrot.slane %v826_v12, 4  ;;  %v834_v21 = vsel %vm807_vm6, 0, %v833_v13  ;;  %v865_v22 = vpack.i.b16 %v854_v62, %v826_v12  ;;  %v867_v23 = vshrl.u32 %v826_v12, 16 }
 0x297   : > { %v885_v24 = vpack.i.b16 %v884_v18, %v883_v15  ;;  %v889_v25 = vpack.i.b16 %v862_v8, %v834_v21  ;;  %v891_v26 = vshrl.u32 %v834_v21, 16  ;;  %v895_v27 = vrot.slane %v881_v14, 4  ;;  %979 = vrot.lane.b32.xlu2 %v3491_v63, %s3073_s3 }
 0x298   : > { %v832_v29 = vsel %vm807_vm6, 0, %v831_v20  ;;  %v869_v30 = vpack.i.b16 %v868_v16, %v867_v23 }
 0x299   : > { %v873_v31 = vpack.i.b16 %v860_v17, %v832_v29  ;;  %v875_v32 = vshrl.u32 %v832_v29, 16  ;;  %v893_v33 = vpack.i.b16 %v892_v19, %v891_v26  ;;  %v901_v34 = vrot.slane %v889_v25, 4  ;;  %v976_v25 = vpop.permute.xlu1 %975 }
 0x29a   : > { %v923_v35 = vrot.slane %v885_v24, 4  ;;  %v896_v36 = vsel %vm807_vm6, %v895_v27, %v865_v22 }
 0x29b   : > { %v929_v40 = vrot.slane %v893_v33, 4  ;;  %v877_v41 = vpack.i.b16 %v876_v28, %v875_v32  ;;  %v900_v42 = vperm.slane %v896_v36, %v3468_v44  ;;  %v902_v43 = vsel %vm807_vm6, %v901_v34, %v873_v31 }
 0x29c   : > { %v906_v45 = vperm.slane %v902_v43, %v3468_v44  ;;  %v924_v46 = vsel %vm807_vm6, %v923_v35, %v869_v30 }
 0x29d   : > { %v909_v47 = vrot.slane %v900_v42, 4  ;;  %v928_v48 = vperm.slane %v924_v46, %v3468_v44  ;;  %v930_v49 = vsel %vm807_vm6, %v929_v40, %v877_v41 }
 0x29e   : > { %v907_v51 = vrot.slane %v906_v45, 4  ;;  %v934_v52 = vperm.slane %v930_v49, %v3468_v44 }
 0x29f   : > { %1177 = vrot.lane.b32.xlu2 %v3473_v50, %s3075_s22  ;;  %v937_v53 = vrot.slane %v928_v48, 4  ;;  %v910_v54 = vsel %vm807_vm6, %v906_v45, %v909_v47 }
 0x2a0   : > { %v908_v56 = vsel %vm807_vm6, %v907_v51, %v900_v42  ;;  %v935_v57 = vrot.slane %v934_v52, 4  ;;  %v3522_v58 = vperm.slane %v910_v54, %v3483_v55 }
 0x2a1   : > { %v3525_v59 = vperm.slane %v908_v56, %v3483_v55  ;;  %v938_v60 = vsel %vm807_vm6, %v934_v52, %v937_v53 }
 0x2a2   : > { %v936_v61 = vsel %vm807_vm6, %v935_v57, %v928_v48  ;;  %v3530_v62 = vperm.slane %v938_v60, %v3483_v55  ;;  %v921_v50 = vrot.slane %v3522_v58, 4  ;;  %v966_v3 = vshrl.u32 %v3522_v58, 16 }
 0x2a3   : > { %v3534_v0 = vperm.slane %v936_v61, %v3483_v55  ;;  %v954_v1 = vshrl.u32 %v3525_v59, 16  ;;  %v919_v2 = vrot.slane %v3525_v59, 4 }
 0x2a4   : > { %v965_v4 = vpack.i.b16 %v3530_v62, %v3522_v58  ;;  %v967_v5 = vshrl.u32 %v3530_v62, 16  ;;  %v3543_v6 = vsel %vm807_vm6, 0, %v921_v50  ;;  %v949_v7 = vrot.slane %v3530_v62, 4 }
 0x2a5   : > { %v953_v8 = vpack.i.b16 %v3534_v0, %v3525_v59  ;;  %v955_v10 = vshrl.u32 %v3534_v0, 16  ;;  %v3550_v11 = vsel %vm807_vm6, 0, %v919_v2  ;;  %v947_v12 = vrot.slane %v3534_v0, 4 }
 0x2a6   : > { %v3553_v13 = vpack.i.b16 %v967_v5, %v966_v3  ;;  %v3556_v14 = vsel %vm807_vm6, 0, %v949_v7  ;;  %v972_v15 = vshrl.u32 %v3543_v6, 16  ;;  %v960_v21 = vshrl.u32 %v3550_v11, 16 }
 0x2a7   : > { %1179 = vrot.lane.b32.xlu2 %v3455_v37, %s3075_s22  ;;  %v3561_v16 = vpack.i.b16 %v955_v10, %v954_v1  ;;  %v3564_v17 = vsel %vm807_vm6, 0, %v947_v12  ;;  %v971_v18 = vpack.i.b16 %v3556_v14, %v3543_v6  ;;  %v973_v19 = vshrl.u32 %v3556_v14, 16 }
 0x2a8   : > { %v959_v20 = vpack.i.b16 %v3564_v17, %v3550_v11  ;;  %v961_v22 = vshrl.u32 %v3564_v17, 16 }
 0x2a9   : > { %v3573_v23 = vpack.i.b16 %v973_v19, %v972_v15 }
 0x2aa   : > { %v3575_v37 = vpack.i.b16 %v961_v22, %v960_v21 }
 0x2df   : > { %v988_v27 = vpop.permute.xlu0 %987 }
 0x2e0   : > { %v1005_v28 = vrot.slane %v988_v27, 4 }
 0x2e1   : > { %v986_v24 = vpop.permute.xlu2 %985 }
 0x2e2   : > { %v1027_v33 = vrot.slane %v986_v24, 4 }
 0x2e7   : > { %v982_v51 = vpop.permute.xlu0 %981 }
 0x2e9   : > { %v978_v26 = vpop.permute.xlu2 %977 }
 0x2ea   : > { %v1028_v40 = vsel %vm807_vm6, %v1027_v33, %v978_v26 }
 0x2eb   : > { %v1032_v45 = vperm.slane %v1028_v40, %v3468_v44 }
 0x2ed   : > { %v1041_v54 = vrot.slane %v1032_v45, 4 }
 0x2f0   : > { %v984_v29 = vpop.permute.xlu1 %983 }
 0x2f1   : > { %v980_v30 = vpop.permute.xlu2 %979  ;;  %v999_v31 = vrot.slane %v984_v29, 4 }
 0x2f2   : > { %v1006_v32 = vsel %vm807_vm6, %v1005_v28, %v980_v30 }
 0x2f3   : > { %v1010_v34 = vperm.slane %v1006_v32, %v3468_v44  ;;  %v1000_v35 = vsel %vm807_vm6, %v999_v31, %v976_v25 }
 0x2f4   : > { %v1004_v36 = vperm.slane %v1000_v35, %v3468_v44 }
 0x2f5   : > { %v1011_v41 = vrot.slane %v1010_v34, 4 }
 0x2f6   : > { %v1013_v42 = vrot.slane %v1004_v36, 4 }
 0x2f7   : > { %v1012_v43 = vsel %vm807_vm6, %v1011_v41, %v1004_v36 }
 0x2f8   : > { %v1014_v46 = vsel %vm807_vm6, %v1010_v34, %v1013_v42  ;;  %v990_v47 = vpop.permute.xlu1 %989  ;;  %v1018_v52 = vperm.slane %v1012_v43, %v3483_v55 }
 0x2f9   : > { %v1022_v48 = vperm.slane %v1014_v46, %v3483_v55  ;;  %v1033_v49 = vrot.slane %v990_v47, 4 }
 0x2fa   : > { %v1023_v60 = vrot.slane %v1018_v52, 4  ;;  %v1059_v19 = vshrl.u32 %v1018_v52, 16 }
 0x2fb   : > { %v1034_v53 = vsel %vm807_vm6, %v1033_v49, %v982_v51  ;;  %v1025_v56 = vrot.slane %v1022_v48, 4  ;;  %v1075_v21 = vshrl.u32 %v1022_v48, 16 }
 0x2fc   : > { %v1038_v57 = vperm.slane %v1034_v53, %v3468_v44  ;;  %v1024_v15 = vsel %vm807_vm6, 0, %v1023_v60 }
 0x2fd   : > { %v1026_v2 = vsel %vm807_vm6, 0, %v1025_v56  ;;  %v1067_v34 = vshrl.u32 %v1024_v15, 16 }
 0x2fe   : > { %v1039_v61 = vrot.slane %v1038_v57, 4  ;;  %v1042_v50 = vsel %vm807_vm6, %v1038_v57, %v1041_v54  ;;  %v1083_v27 = vshrl.u32 %v1026_v2, 16 }
 0x2ff   : > { %v1050_v1 = vperm.slane %v1042_v50, %v3483_v55 }
 0x300   : > { %v1040_v3 = vsel %vm807_vm6, %v1039_v61, %v1032_v45 }
 0x301   : > { %v1046_v5 = vperm.slane %v1040_v3, %v3483_v55  ;;  %v1053_v7 = vrot.slane %v1050_v1, 4  ;;  %v1073_v10 = vpack.i.b16 %v1050_v1, %v1022_v48  ;;  %v1076_v12 = vshrl.u32 %v1050_v1, 16 }
 0x303   : > { %v1051_v22 = vrot.slane %v1046_v5, 4  ;;  %v1054_v24 = vsel %vm807_vm6, 0, %v1053_v7  ;;  %v1060_v25 = vshrl.u32 %v1046_v5, 16  ;;  %v1087_v26 = vrot.slane %v1073_v10, 4 }
 0x304   : > { %v1081_v28 = vpack.i.b16 %v1054_v24, %v1026_v2  ;;  %v1084_v29 = vshrl.u32 %v1054_v24, 16  ;;  %v1057_v30 = vpack.i.b16 %v1046_v5, %v1018_v52  ;;  %v1077_v33 = vpack.i.b16 %v1076_v12, %v1075_v21 }
 0x305   : > { %v1052_v31 = vsel %vm807_vm6, 0, %v1051_v22  ;;  %v1061_v32 = vpack.i.b16 %v1060_v25, %v1059_v19 }
 0x306   : > { %v1068_v35 = vshrl.u32 %v1052_v31, 16  ;;  %v1065_v36 = vpack.i.b16 %v1052_v31, %v1024_v15  ;;  %v1085_v40 = vpack.i.b16 %v1084_v29, %v1083_v27  ;;  %v1088_v41 = vsel %vm807_vm6, %v1087_v26, %v1057_v30 }
 0x307   : > { %v1093_v42 = vrot.slane %v1081_v28, 4  ;;  %v1115_v43 = vrot.slane %v1077_v33, 4  ;;  %v1092_v46 = vperm.slane %v1088_v41, %v3468_v44 }
 0x308   : > { %v1069_v45 = vpack.i.b16 %v1068_v35, %v1067_v34  ;;  %v1121_v47 = vrot.slane %v1085_v40, 4 }
 0x309   : > { %v1094_v48 = vsel %vm807_vm6, %v1093_v42, %v1065_v36  ;;  %v1116_v49 = vsel %vm807_vm6, %v1115_v43, %v1061_v32  ;;  %v1101_v54 = vrot.slane %v1092_v46, 4 }
 0x30a   : > { %v1098_v51 = vperm.slane %v1094_v48, %v3468_v44  ;;  %v1120_v52 = vperm.slane %v1116_v49, %v3468_v44  ;;  %v1122_v53 = vsel %vm807_vm6, %v1121_v47, %v1069_v45 }
 0x30b   : > { %v1126_v56 = vperm.slane %v1122_v53, %v3468_v44 }
 0x30c   : > { %v1099_v57 = vrot.slane %v1098_v51, 4  ;;  %v1102_v60 = vsel %vm807_vm6, %v1098_v51, %v1101_v54  ;;  %v1129_v61 = vrot.slane %v1120_v52, 4 }
 0x30d   : > { %v1127_v50 = vrot.slane %v1126_v56, 4  ;;  %v1110_v1 = vperm.slane %v1102_v60, %v3483_v55 }
 0x30e   : > { %v1100_v2 = vsel %vm807_vm6, %v1099_v57, %v1092_v46  ;;  %v1130_v3 = vsel %vm807_vm6, %v1126_v56, %v1129_v61 }
 0x30f   : > { %v1106_v5 = vperm.slane %v1100_v2, %v3483_v55  ;;  %v1128_v7 = vsel %vm807_vm6, %v1127_v50, %v1120_v52  ;;  %v1138_v10 = vperm.slane %v1130_v3, %v3483_v55  ;;  %v1113_v15 = vrot.slane %v1110_v1, 4 }
 0x310   : > { %v1134_v12 = vperm.slane %v1128_v7, %v3483_v55  ;;  %v1158_v22 = vshrl.u32 %v1110_v1, 16 }
 0x311   : > { %v1157_v19 = vpack.i.b16 %v1138_v10, %v1110_v1  ;;  %v1111_v21 = vrot.slane %v1106_v5, 4  ;;  %v1159_v24 = vshrl.u32 %v1138_v10, 16  ;;  %v1146_v26 = vshrl.u32 %v1106_v5, 16 }
 0x312   : > { %v1145_v25 = vpack.i.b16 %v1134_v12, %v1106_v5  ;;  %v1147_v27 = vshrl.u32 %v1134_v12, 16  ;;  %v1139_v28 = vrot.slane %v1134_v12, 4  ;;  %v1114_v31 = vsel %vm807_vm6, 0, %v1113_v15  ;;  %v1178_v12 = vpop.permute.xlu2 %1177 }
 0x313   : > { %v1112_v29 = vsel %vm807_vm6, 0, %v1111_v21  ;;  %v1160_v30 = vpack.i.b16 %v1159_v24, %v1158_v22  ;;  %v1141_v32 = vrot.slane %v1138_v10, 4  ;;  %v1440_v34 = vsel %vm1359_vm7, %v1157_v19, 0  ;;  %v3666_v10 = vpop.permute.xlu0 %1175  ;;  %v3670_v21 = vpop.permute.xlu1 %1167 }
 0x314   : > { %v1364_v33 = vsel %vm1359_vm7, %v1145_v25, 0  ;;  %v1148_v35 = vpack.i.b16 %v1147_v27, %v1146_v26  ;;  %v1140_v36 = vsel %vm807_vm6, 0, %v1139_v28  ;;  %v1152_v41 = vshrl.u32 %v1112_v29, 16 }
 0x315   : > { %1373 = vmatpush.bf16.xpose.msra.mxu1 %v1364_v33  ;;  %v1151_v40 = vpack.i.b16 %v1140_v36, %v1112_v29  ;;  %v1153_v42 = vshrl.u32 %v1140_v36, 16  ;;  %v1142_v43 = vsel %vm807_vm6, 0, %v1141_v32  ;;  %v1164_v47 = vshrl.u32 %v1114_v31, 16 }
 0x316   : > { %v1383_v45 = vsel %vm1359_vm7, %v1148_v35, 0  ;;  %v1163_v46 = vpack.i.b16 %v1142_v43, %v1114_v31  ;;  %v1165_v48 = vshrl.u32 %v1142_v43, 16  ;;  %v1459_v51 = vsel %vm1359_vm7, %v1160_v30, 0 }
 0x317   : > { %1392 = vmatpush.bf16.xpose.msra.mxu2 %v1383_v45  ;;  %v1402_v49 = vsel %vm1359_vm7, %v1151_v40, 0  ;;  %v1154_v52 = vpack.i.b16 %v1153_v42, %v1152_v41 }
 0x318   : > { %1411 = vmatpush.bf16.xpose.msra.mxu3 %v1402_v49  ;;  %v1478_v53 = vsel %vm1359_vm7, %v1163_v46, 0  ;;  %v1166_v54 = vpack.i.b16 %v1165_v48, %v1164_v47 }
 0x319   : > { %v1421_v56 = vsel %vm1359_vm7, %v1154_v52, 0 }
 0x31a   : > { %1430 = vmatpush.bf16.xpose.msrb.mxu0 %v1421_v56  ;;  %v1497_v57 = vsel %vm1359_vm7, %v1166_v54, 0  ;;  %v3668_v19 = vpop.permute.xlu2 %1179 }
 0x31b   : > { %v1170_v15 = vpop.permute.xlu0 %1169 }
 0x31c   : > { %2455 = vmatmul.msk.bf16.vlgmr.msra.gmra.mxu1 %vm1359_vm7, %v953_v8 }
 0x31d   : > { %1449 = vmatpush.bf16.xpose.msrb.mxu1 %v1440_v34 }
 0x31e   : > { %2456 = vmatmul.msk.bf16.vlgmr.msra.gmra.mxu2 %vm1359_vm7, %v3561_v16 }
 0x31f   : > { %1468 = vmatpush.bf16.xpose.msrb.mxu2 %v1459_v51  ;;  %2457 = vmatmul.msk.bf16.vlgmr.msra.gmra.mxu3 %vm1359_vm7, %v959_v20 }
 0x320   : > { %1487 = vmatpush.bf16.xpose.msrb.mxu3 %v1478_v53 }
 0x321   : > { %2458 = vmatmul.msk.bf16.vlgmr.msrb.gmra.mxu0 %vm1359_vm7, %v3575_v37 }
 0x322   : > { %1506 = vmatpush.bf16.xpose.msra.mxu0 %v1497_v57 }
 0x32c   : > { %2459 = vmatmul.msk.bf16.vlgmr.msrb.gmra.mxu1 %vm1359_vm7, %v965_v4 }
 0x32e   : > { %2460 = vmatmul.msk.bf16.vlgmr.msrb.gmra.mxu2 %vm1359_vm7, %v3553_v13 }
 0x32f   : > { %2461 = vmatmul.msk.bf16.vlgmr.msrb.gmra.mxu3 %vm1359_vm7, %v971_v18 }
 0x331   : > { %2462 = vmatmul.msk.bf16.vlgmr.msra.gmra.mxu0 %vm1359_vm7, %v3573_v23 }
 0x399   : > { %v1375_v59 = vpop.f32.mrf.mxu1 }
 0x39a   : > { %v1513_v0 = vsel %vm1512_vm8, %v1375_v59, -inf }
 0x39b   : > { %1514 = vmax.xlane.f32.xlu0 %v1513_v0 }
 0x39e   : > { %v1432_v8 = vpop.f32.mrf.mxu0 }
 0x39f   : > { %v1522_v58 = vsel %vm1512_vm8, %v1432_v8, -inf }
 0x3a0   : > { %1523 = vmax.xlane.f32.xlu2 %v1522_v58  ;;  %v1219_v58 = vrot.slane %v1178_v12, 4 }
 0x3a1   : > { %v1377_v62 = vpop.f32.mrf.mxu1  ;;  %v1394_v4 = vpop.f32.mrf.mxu2 }
 0x3a2   : > { %v1413_v11 = vpop.f32.mrf.mxu3  ;;  %v1516_v13 = vsel %vm1512_vm8, %v1394_v4, -inf }
 0x3a3   : > { %1517 = vmax.xlane.f32.xlu1 %v1516_v13  ;;  %v1519_v14 = vsel %vm1512_vm8, %v1413_v11, -inf }
 0x3a6   : > { %v1434_v6 = vpop.f32.mrf.mxu0 }
 0x3a8   : > { %1520 = vmax.xlane.f32.xlu2 %v1519_v14 }
 0x3a9   : > { %v1396_v16 = vpop.f32.mrf.mxu2  ;;  %v1451_v17 = vpop.f32.mrf.mxu1 }
 0x3aa   : > { %v1415_v18 = vpop.f32.mrf.mxu3  ;;  %v1525_v23 = vsel %vm1512_vm8, %v1451_v17, -inf }
 0x3ab   : > { %v1191_v18 = vrot.slane %v3666_v10, 4 }
 0x3ae   : > { %v3653_v20 = vpop.f32.mrf.mxu0 }
 0x3af   : > { %v1534_v37 = vsel %vm1512_vm8, %v3653_v20, -inf }
 0x3b0   : > { %1526 = vmax.xlane.f32.xlu2 %v1525_v23  ;;  %1535 = vmax.xlane.f32.xlu1 %v1534_v37 }
 0x3b1   : > { %v1453_v60 = vpop.f32.mrf.mxu1  ;;  %v1470_v61 = vpop.f32.mrf.mxu2 }
 0x3b2   : > { %v1489_v50 = vpop.f32.mrf.mxu3  ;;  %v1528_v3 = vsel %vm1512_vm8, %v1470_v61, -inf  ;;  %v1192_v60 = vsel %vm807_vm6, %v1191_v18, %v3670_v21 }
 0x3b3   : > { %v1531_v1 = vsel %vm1512_vm8, %v1489_v50, -inf }
 0x3b4   : > { %1532 = vmax.xlane.f32.xlu0 %v1531_v1 }
 0x3b6   : > { %v1510_v2 = vpop.f32.mrf.mxu0 }
 0x3b8   : > { %1529 = vmax.xlane.f32.xlu1 %v1528_v3  ;;  %v1196_v3 = vperm.slane %v1192_v60, %v3468_v44 }
 0x3b9   : > { %v1472_v5 = vpop.f32.mrf.mxu2 }
 0x3ba   : > { %v1491_v7 = vpop.f32.mrf.mxu3 }
 0x3bb   : > { %v1197_v7 = vrot.slane %v3668_v19, 4 }
 0x3c8   : > { %1181 = vrot.lane.b32.xlu0 %v3463_v39, %s3075_s22  ;;  %1173 = vrot.lane.b32.xlu2 %v3459_v38, %s3075_s22 }
 0x3d1   : > { %1171 = vrot.lane.b32.xlu1 %v3491_v63, %s3075_s22 }
 0x40e   : > { %v1515_v22 = vpop.xlane.xlu0 %1514 }
 0x40f   : > { %v1537_v24 = vsub.f32 %v1375_v59, %v1515_v22 }
 0x411   : > { %v1545_v25 = vmul.f32 1.442695, %v1537_v24  ;;  %v1205_v24 = vrot.slane %v1196_v3, 4 }
 0x413   : > { %2678 = vpow2.f32 %v1545_v25  ;;  %v1524_v26 = vpop.xlane.xlu2 %1523 }
 0x414   : > { %v1540_v38 = vsub.f32 %v1432_v8, %v1524_v26 }
 0x416   : > { %v1518_v39 = vpop.xlane.xlu1 %1517  ;;  %v1551_v32 = vmul.f32 1.442695, %v1540_v38 }
 0x417   : > { %v1538_v27 = vsub.f32 %v1394_v4, %v1518_v39 }
 0x419   : > { %v3672_v28 = vpop.eup %2678  ;;  %v1547_v29 = vmul.f32 1.442695, %v1538_v27 }
 0x41a   : > { %v1561_v63 = vsel %vm1512_vm8, %v3672_v28, 0.0 }
 0x41b   : > { %2680 = vpow2.f32 %v1547_v29  ;;  %1562 = vadd.xlane.f32.xlu2 %v1561_v63  ;;  %v1521_v30 = vpop.xlane.xlu2 %1520 }
 0x41c   : > { %v1539_v31 = vsub.f32 %v1413_v11, %v1521_v30  ;;  %v1220_v11 = vsel %vm807_vm6, %v1219_v58, %v1170_v15 }
 0x41d   : > { %v1224_v6 = vperm.slane %v1220_v11, %v3468_v44 }
 0x41e   : > { %v1549_v33 = vmul.f32 1.442695, %v1539_v31 }
 0x41f   : > { %v1233_v37 = vrot.slane %v1224_v6, 4 }
 0x420   : > { %2682 = vpow2.f32 %v1549_v33 }
 0x421   : > { %v3676_v34 = vpop.eup %2680  ;;  %2684 = vpow2.f32 %v1551_v32 }
 0x422   : > { %v1564_v35 = vsel %vm1512_vm8, %v3676_v34, 0.0 }
 0x423   : > { %1565 = vadd.xlane.f32.xlu0 %v1564_v35  ;;  %v1527_v36 = vpop.xlane.xlu2 %1526  ;;  %v1536_v40 = vpop.xlane.xlu1 %1535 }
 0x424   : > { %v1541_v41 = vsub.f32 %v1451_v17, %v1527_v36  ;;  %v1544_v54 = vsub.f32 %v3653_v20, %v1536_v40 }
 0x426   : > { %v3680_v42 = vpop.eup %2682  ;;  %v1553_v43 = vmul.f32 1.442695, %v1541_v41  ;;  %v1559_v0 = vmul.f32 1.442695, %v1544_v54 }
 0x427   : > { %v3682_v45 = vpop.eup %2684  ;;  %v1533_v46 = vpop.xlane.xlu0 %1532  ;;  %v1567_v47 = vsel %vm1512_vm8, %v3680_v42, 0.0 }
 0x428   : > { %v1543_v48 = vsub.f32 %v1489_v50, %v1533_v46  ;;  %1568 = vadd.xlane.f32.xlu1 %v1567_v47  ;;  %2686 = vpow2.f32 %v1553_v43  ;;  %v1570_v51 = vsel %vm1512_vm8, %v3682_v45, 0.0 }
 0x42a   : > { %v1557_v49 = vmul.f32 1.442695, %v1543_v48 }
 0x42b   : > { %1571 = vadd.xlane.f32.xlu0 %v1570_v51  ;;  %v1530_v52 = vpop.xlane.xlu1 %1529  ;;  %v1174_v20 = vpop.permute.xlu2 %1173 }
 0x42c   : > { %2688 = vpow2.f32 %v1557_v49  ;;  %v1542_v53 = vsub.f32 %v1470_v61, %v1530_v52 }
 0x42e   : > { %v1555_v56 = vmul.f32 1.442695, %v1542_v53  ;;  %v3689_v57 = vpop.eup %2686 }
 0x42f   : > { %v1573_v8 = vsel %vm1512_vm8, %v3689_v57, 0.0 }
 0x430   : > { %2690 = vpow2.f32 %v1555_v56 }
 0x431   : > { %2692 = vpow2.f32 %v1559_v0 }
 0x432   : > { %v3691_v59 = vpop.eup %2688 }
 0x433   : > { %1574 = vadd.xlane.f32.xlu0 %v1573_v8  ;;  %v1579_v62 = vsel %vm1512_vm8, %v3691_v59, 0.0 }
 0x434   : > { %1580 = vadd.xlane.f32.xlu2 %v1579_v62 }
 0x436   : > { %v3697_v4 = vpop.eup %2690 }
 0x437   : > { %v1576_v13 = vsel %vm1512_vm8, %v3697_v4, 0.0  ;;  %v3703_v17 = vpop.eup %2692 }
 0x438   : > { %1577 = vadd.xlane.f32.xlu1 %v1576_v13  ;;  %v1582_v50 = vsel %vm1512_vm8, %v3703_v17, 0.0 }
 0x43a   : > { %v1182_v14 = vpop.permute.xlu0 %1181 }
 0x43b   : > { %v1225_v16 = vrot.slane %v1182_v14, 4 }
 0x43d   : > { %v1226_v23 = vsel %vm807_vm6, %v1225_v16, %v1174_v20 }
 0x43e   : > { %v1230_v61 = vperm.slane %v1226_v23, %v3468_v44 }
 0x440   : > { %v1231_v1 = vrot.slane %v1230_v61, 4  ;;  %v1234_v2 = vsel %vm807_vm6, %v1230_v61, %v1233_v37  ;;  %1583 = vadd.xlane.f32.xlu1 %v1582_v50 }
 0x441   : > { %v1242_v5 = vperm.slane %v1234_v2, %v3483_v55 }
 0x442   : > { %v1232_v10 = vsel %vm807_vm6, %v1231_v1, %v1224_v6 }
 0x443   : > { %v1238_v12 = vperm.slane %v1232_v10, %v3483_v55  ;;  %v1172_v15 = vpop.permute.xlu1 %1171  ;;  %v1245_v21 = vrot.slane %v1242_v5, 4  ;;  %v1268_v35 = vshrl.u32 %v1242_v5, 16 }
 0x444   : > { %v1198_v22 = vsel %vm807_vm6, %v1197_v7, %v1172_v15 }
 0x445   : > { %v1202_v25 = vperm.slane %v1198_v22, %v3468_v44  ;;  %v1243_v26 = vrot.slane %v1238_v12, 4  ;;  %v1246_v38 = vsel %vm807_vm6, 0, %v1245_v21  ;;  %v1252_v33 = vshrl.u32 %v1238_v12, 16 }
 0x446   : > { %v1276_v40 = vshrl.u32 %v1246_v38, 16 }
 0x447   : > { %v1203_v39 = vrot.slane %v1202_v25, 4  ;;  %v1206_v27 = vsel %vm807_vm6, %v1202_v25, %v1205_v24  ;;  %v1244_v36 = vsel %vm807_vm6, 0, %v1243_v26 }
 0x448   : > { %v1214_v29 = vperm.slane %v1206_v27, %v3483_v55  ;;  %v1260_v53 = vshrl.u32 %v1244_v36, 16 }
 0x449   : > { %v1204_v19 = vsel %vm807_vm6, %v1203_v39, %v1196_v3 }
 0x44a   : > { %v1210_v63 = vperm.slane %v1204_v19, %v3483_v55  ;;  %v1217_v30 = vrot.slane %v1214_v29, 4  ;;  %v1265_v31 = vpack.i.b16 %v1242_v5, %v1214_v29  ;;  %v1267_v32 = vshrl.u32 %v1214_v29, 16 }
 0x44c   : > { %v1215_v41 = vrot.slane %v1210_v63, 4  ;;  %v1218_v43 = vsel %vm807_vm6, 0, %v1217_v30  ;;  %v1249_v46 = vpack.i.b16 %v1238_v12, %v1210_v63  ;;  %v1251_v47 = vshrl.u32 %v1210_v63, 16 }
 0x44d   : > { %v1269_v48 = vpack.i.b16 %v1268_v35, %v1267_v32  ;;  %v1273_v49 = vpack.i.b16 %v1246_v38, %v1218_v43  ;;  %v1275_v51 = vshrl.u32 %v1218_v43, 16  ;;  %v1279_v52 = vrot.slane %v1265_v31, 4 }
 0x44e   : > { %v1216_v54 = vsel %vm807_vm6, 0, %v1215_v41  ;;  %v1253_v56 = vpack.i.b16 %v1252_v33, %v1251_v47 }
 0x44f   : > { %v1257_v0 = vpack.i.b16 %v1244_v36, %v1216_v54  ;;  %v1259_v8 = vshrl.u32 %v1216_v54, 16  ;;  %v1277_v58 = vpack.i.b16 %v1276_v40, %v1275_v51  ;;  %v1285_v62 = vrot.slane %v1273_v49, 4 }
 0x450   : > { %v1307_v11 = vrot.slane %v1269_v48, 4  ;;  %v1280_v13 = vsel %vm807_vm6, %v1279_v52, %v1249_v46 }
 0x451   : > { %v1261_v6 = vpack.i.b16 %v1260_v53, %v1259_v8  ;;  %v1313_v14 = vrot.slane %v1277_v58, 4  ;;  %v1284_v16 = vperm.slane %v1280_v13, %v3468_v44  ;;  %v1286_v18 = vsel %vm807_vm6, %v1285_v62, %v1257_v0 }
 0x452   : > { %v1290_v20 = vperm.slane %v1286_v18, %v3468_v44  ;;  %v1308_v23 = vsel %vm807_vm6, %v1307_v11, %v1253_v56 }
 0x453   : > { %v1312_v37 = vperm.slane %v1308_v23, %v3468_v44  ;;  %v1314_v60 = vsel %vm807_vm6, %v1313_v14, %v1261_v6  ;;  %v1293_v61 = vrot.slane %v1284_v16, 4 }
 0x454   : > { %v1291_v50 = vrot.slane %v1290_v20, 4  ;;  %v1318_v1 = vperm.slane %v1314_v60, %v3468_v44 }
 0x455   : > { %v1294_v2 = vsel %vm807_vm6, %v1290_v20, %v1293_v61  ;;  %v1321_v3 = vrot.slane %v1312_v37, 4 }
 0x456   : > { %v1292_v5 = vsel %vm807_vm6, %v1291_v50, %v1284_v16  ;;  %v1319_v7 = vrot.slane %v1318_v1, 4  ;;  %v1302_v10 = vperm.slane %v1294_v2, %v3483_v55 }
 0x457   : > { %v1298_v12 = vperm.slane %v1292_v5, %v3483_v55  ;;  %v1322_v15 = vsel %vm807_vm6, %v1318_v1, %v1321_v3 }
 0x458   : > { %v1320_v21 = vsel %vm807_vm6, %v1319_v7, %v1312_v37  ;;  %v1330_v22 = vperm.slane %v1322_v15, %v3483_v55  ;;  %v1305_v24 = vrot.slane %v1302_v10, 4  ;;  %v1350_v39 = vshrl.u32 %v1302_v10, 16 }
 0x459   : > { %v1326_v25 = vperm.slane %v1320_v21, %v3483_v55  ;;  %v1303_v26 = vrot.slane %v1298_v12, 4  ;;  %v1338_v38 = vshrl.u32 %v1298_v12, 16 }
 0x45a   : > { %v1349_v27 = vpack.i.b16 %v1330_v22, %v1302_v10  ;;  %v1351_v29 = vshrl.u32 %v1330_v22, 16  ;;  %v1333_v19 = vrot.slane %v1330_v22, 4  ;;  %v1306_v35 = vsel %vm807_vm6, 0, %v1305_v24 }
 0x45b   : > { %v1337_v63 = vpack.i.b16 %v1326_v25, %v1298_v12  ;;  %v1339_v30 = vshrl.u32 %v1326_v25, 16  ;;  %v1304_v31 = vsel %vm807_vm6, 0, %v1303_v26  ;;  %v1331_v32 = vrot.slane %v1326_v25, 4 }
 0x45c   : > { %v1352_v33 = vpack.i.b16 %v1351_v29, %v1350_v39  ;;  %v1334_v36 = vsel %vm807_vm6, 0, %v1333_v19  ;;  %v1690_v47 = vsel %vm1612_vm9, %v1349_v27, 0  ;;  %v1344_v49 = vshrl.u32 %v1304_v31, 16 }
 0x45d   : > { %v1614_v40 = vsel %vm1612_vm9, %v1337_v63, 0  ;;  %v1340_v41 = vpack.i.b16 %v1339_v30, %v1338_v38  ;;  %v1332_v43 = vsel %vm807_vm6, 0, %v1331_v32  ;;  %v1355_v46 = vpack.i.b16 %v1334_v36, %v1306_v35 }
 0x45e   : > { %1623 = vmatpush.bf16.msra.mxu1 %v1614_v40  ;;  %v1343_v48 = vpack.i.b16 %v1332_v43, %v1304_v31  ;;  %v1345_v51 = vshrl.u32 %v1332_v43, 16  ;;  %v1356_v53 = vshrl.u32 %v1306_v35, 16  ;;  %v1357_v54 = vshrl.u32 %v1334_v36, 16 }
 0x45f   : > { %v1633_v52 = vsel %vm1612_vm9, %v1340_v41, 0  ;;  %v1709_v0 = vsel %vm1612_vm9, %v1352_v33, 0  ;;  %v1728_v58 = vsel %vm1612_vm9, %v1355_v46, 0 }
 0x460   : > { %1642 = vmatpush.bf16.msra.mxu2 %v1633_v52  ;;  %v1652_v56 = vsel %vm1612_vm9, %v1343_v48, 0  ;;  %v1346_v8 = vpack.i.b16 %v1345_v51, %v1344_v49  ;;  %v1358_v62 = vpack.i.b16 %v1357_v54, %v1356_v53 }
 0x461   : > { %1661 = vmatpush.bf16.msra.mxu3 %v1652_v56 }
 0x462   : > { %1699 = vmatpush.bf16.msrb.mxu1 %v1690_v47  ;;  %v1671_v11 = vsel %vm1612_vm9, %v1346_v8, 0  ;;  %v1747_v13 = vsel %vm1612_vm9, %v1358_v62, 0 }
 0x463   : > { %1680 = vmatpush.bf16.msrb.mxu0 %v1671_v11 }
 0x464   : > { %1718 = vmatpush.bf16.msrb.mxu2 %v1709_v0 }
 0x465   : > { %1737 = vmatpush.bf16.msrb.mxu3 %v1728_v58 }
 0x467   : > { %1756 = vmatpush.bf16.msra.mxu0 %v1747_v13 }
 0x48e   : > { %v1563_v6 = vpop.xlane.xlu2 %1562 }
 0x48f   : > { %2694 = vrcp.f32 %v1563_v6 }
 0x495   : > { %v2695_v14 = vpop.eup %2694 }
 0x496   : > { %v1593_v16 = vmul.f32 %v2695_v14, %v3672_v28  ;;  %v1566_v18 = vpop.xlane.xlu0 %1565 }
 0x497   : > { %2696 = vrcp.f32 %v1566_v18 }
 0x498   : > { %v1601_v20 = vpack.c.bf16 %v1593_v16, %v1593_v16 }
 0x49a   : > { %2463 = vmatmul.msk.bf16.vlgmr.msra.gmra.mxu1 %vm1512_vm8, %v1601_v20 }
 0x49b   : > { %v1569_v23 = vpop.xlane.xlu1 %1568 }
 0x49c   : > { %2698 = vrcp.f32 %v1569_v23 }
 0x49d   : > { %v2697_v37 = vpop.eup %2696 }
 0x49e   : > { %v1594_v60 = vmul.f32 %v2697_v37, %v3676_v34  ;;  %v1572_v61 = vpop.xlane.xlu0 %1571 }
 0x49f   : > { %2700 = vrcp.f32 %v1572_v61 }
 0x4a0   : > { %v1602_v50 = vpack.c.bf16 %v1594_v60, %v1594_v60 }
 0x4a2   : > { %v2699_v1 = vpop.eup %2698  ;;  %2464 = vmatmul.msk.bf16.vlgmr.msra.gmra.mxu2 %vm1512_vm8, %v1602_v50 }
 0x4a3   : > { %v1595_v2 = vmul.f32 %v2699_v1, %v3680_v42 }
 0x4a5   : > { %v2701_v3 = vpop.eup %2700  ;;  %v1603_v28 = vpack.c.bf16 %v1595_v2, %v1595_v2 }
 0x4a6   : > { %v1596_v5 = vmul.f32 %v2701_v3, %v3682_v45  ;;  %v1575_v7 = vpop.xlane.xlu0 %1574 }
 0x4a7   : > { %2702 = vrcp.f32 %v1575_v7  ;;  %v1581_v10 = vpop.xlane.xlu2 %1580  ;;  %2465 = vmatmul.msk.bf16.vlgmr.msra.gmra.mxu3 %vm1512_vm8, %v1603_v28 }
 0x4a8   : > { %v1604_v12 = vpack.c.bf16 %v1596_v5, %v1596_v5  ;;  %2704 = vrcp.f32 %v1581_v10 }
 0x4aa   : > { %2466 = vmatmul.msk.bf16.vlgmr.msrb.gmra.mxu0 %vm1512_vm8, %v1604_v12 }
 0x4ab   : > { %v1578_v34 = vpop.xlane.xlu1 %1577 }
 0x4ac   : > { %2706 = vrcp.f32 %v1578_v34 }
 0x4ad   : > { %v2703_v15 = vpop.eup %2702 }
 0x4ae   : > { %v2705_v21 = vpop.eup %2704  ;;  %v1597_v22 = vmul.f32 %v2703_v15, %v3689_v57 }
 0x4af   : > { %v1599_v24 = vmul.f32 %v2705_v21, %v3691_v59 }
 0x4b0   : > { %v1605_v42 = vpack.c.bf16 %v1597_v22, %v1597_v22 }
 0x4b1   : > { %v1607_v39 = vpack.c.bf16 %v1599_v24, %v1599_v24 }
 0x4b2   : > { %v2707_v25 = vpop.eup %2706  ;;  %2467 = vmatmul.msk.bf16.vlgmr.msrb.gmra.mxu1 %vm1512_vm8, %v1605_v42 }
 0x4b3   : > { %v1598_v45 = vmul.f32 %v2707_v25, %v3697_v4  ;;  %v1584_v26 = vpop.xlane.xlu1 %1583 }
 0x4b4   : > { %2708 = vrcp.f32 %v1584_v26 }
 0x4b5   : > { %v1606_v27 = vpack.c.bf16 %v1598_v45, %v1598_v45 }
 0x4b7   : > { %2468 = vmatmul.msk.bf16.vlgmr.msrb.gmra.mxu2 %vm1512_vm8, %v1606_v27  ;;  %2469 = vmatmul.msk.bf16.vlgmr.msrb.gmra.mxu3 %vm1512_vm8, %v1607_v39 }
 0x4ba   : > { %v2709_v38 = vpop.eup %2708 }
 0x4bb   : > { %v1600_v29 = vmul.f32 %v2709_v38, %v3703_v17 }
 0x4bd   : > { %v1608_v57 = vpack.c.bf16 %v1600_v29, %v1600_v29 }
 0x4bf   : > { %2470 = vmatmul.msk.bf16.vlgmr.msra.gmra.mxu0 %vm1512_vm8, %v1608_v57 }
 0x517   : > { %v1625_v59 = vpop.f32.mrf.mxu1 }
 0x518   : > { %v1762_v41 = vpack.c.bf16 %v1625_v59, %v1625_v59 }
 0x51f   : > { %v1627_v19 = vpop.f32.mrf.mxu1 }
 0x525   : > { %v1644_v63 = vpop.f32.mrf.mxu2 }
 0x526   : > { %v1763_v51 = vpack.c.bf16 %v1644_v63, %v1644_v63 }
 0x527   : > { %v1682_v30 = vpop.f32.mrf.mxu0 }
 0x528   : > { %v1765_v58 = vpack.c.bf16 %v1682_v30, %v1682_v30 }
 0x52a   : > { %v1663_v31 = vpop.f32.mrf.mxu3 }
 0x52b   : > { %v1764_v54 = vpack.c.bf16 %v1663_v31, %v1663_v31 }
 0x52d   : > { %v1646_v4 = vpop.f32.mrf.mxu2 }
 0x52f   : > { %v1684_v32 = vpop.f32.mrf.mxu0  ;;  %v1701_v33 = vpop.f32.mrf.mxu1 }
 0x530   : > { %v1766_v35 = vpack.c.bf16 %v1701_v33, %v1701_v33 }
 0x532   : > { %v1665_v36 = vpop.f32.mrf.mxu3  ;;  %v1770_v40 = vrot.slane %v1766_v35, 4 }
 0x534   : > { %v1771_v46 = vsel %vm807_vm6, %v1770_v40, %v1762_v41 }
 0x535   : > { %v1775_v52 = vperm.slane %v1771_v46, %v3468_v44 }
 0x537   : > { %v1703_v43 = vpop.f32.mrf.mxu1  ;;  %v1784_v6 = vrot.slane %v1775_v52, 4 }
 0x53a   : > { %v1720_v47 = vpop.f32.mrf.mxu2  ;;  %v1739_v17 = vpop.f32.mrf.mxu3 }
 0x53b   : > { %v1767_v48 = vpack.c.bf16 %v1720_v47, %v1720_v47  ;;  %v1768_v49 = vpack.c.bf16 %v1739_v17, %v1739_v17 }
 0x53c   : > { %v1758_v53 = vpop.f32.mrf.mxu0 }
 0x53d   : > { %v1798_v56 = vrot.slane %v1767_v48, 4  ;;  %v1776_v0 = vrot.slane %v1768_v49, 4  ;;  %v1769_v8 = vpack.c.bf16 %v1758_v53, %v1758_v53 }
 0x53f   : > { %v1799_v62 = vsel %vm807_vm6, %v1798_v56, %v1763_v51  ;;  %v1777_v11 = vsel %vm807_vm6, %v1776_v0, %v1764_v54  ;;  %v1804_v13 = vrot.slane %v1769_v8, 4 }
 0x540   : > { %v1803_v14 = vperm.slane %v1799_v62, %v3468_v44  ;;  %v1781_v16 = vperm.slane %v1777_v11, %v3468_v44 }
 0x541   : > { %v1805_v18 = vsel %vm807_vm6, %v1804_v13, %v1765_v58 }
 0x542   : > { %v1812_v20 = vrot.slane %v1803_v14, 4  ;;  %v1782_v23 = vrot.slane %v1781_v16, 4  ;;  %v1785_v37 = vsel %vm807_vm6, %v1781_v16, %v1784_v6  ;;  %v1809_v60 = vperm.slane %v1805_v18, %v3468_v44  ;;  %v1722_v61 = vpop.f32.mrf.mxu2  ;;  %v1741_v50 = vpop.f32.mrf.mxu3 }
 0x543   : > { %v1793_v1 = vperm.slane %v1785_v37, %v3483_v55 }
 0x544   : > { %v1783_v2 = vsel %vm807_vm6, %v1782_v23, %v1775_v52  ;;  %v1810_v3 = vrot.slane %v1809_v60, 4  ;;  %v1813_v28 = vsel %vm807_vm6, %v1809_v60, %v1812_v20  ;;  %v1760_v5 = vpop.f32.mrf.mxu0 }
 0x545   : > { %v1789_v7 = vperm.slane %v1783_v2, %v3483_v55  ;;  %v1796_v10 = vrot.slane %v1793_v1, 4  ;;  %v1821_v12 = vperm.slane %v1813_v28, %v3483_v55  ;;  %v1846_v34 = vshrl.u32 %v1793_v1, 16 }
 0x546   : > { %v1811_v15 = vsel %vm807_vm6, %v1810_v3, %v1803_v14 }
 0x547   : > { %v1794_v21 = vrot.slane %v1789_v7, 4  ;;  %v1797_v22 = vsel %vm807_vm6, 0, %v1796_v10  ;;  %v1830_v42 = vshrl.u32 %v1789_v7, 16  ;;  %v1817_v24 = vperm.slane %v1811_v15, %v3483_v55 }
 0x548   : > { %v1854_v25 = vshrl.u32 %v1797_v22, 16  ;;  %v1824_v45 = vrot.slane %v1821_v12, 4  ;;  %v1844_v26 = vpack.i.b16 %v1821_v12, %v1793_v1  ;;  %v1847_v39 = vshrl.u32 %v1821_v12, 16 }
 0x549   : > { %v1795_v27 = vsel %vm807_vm6, 0, %v1794_v21  ;;  %v1822_v38 = vrot.slane %v1817_v24, 4  ;;  %v1828_v29 = vpack.i.b16 %v1817_v24, %v1789_v7  ;;  %v1831_v57 = vshrl.u32 %v1817_v24, 16 }
 0x54a   : > { %v1838_v59 = vshrl.u32 %v1795_v27, 16  ;;  %v1825_v19 = vsel %vm807_vm6, 0, %v1824_v45  ;;  %v1848_v63 = vpack.i.b16 %v1847_v39, %v1846_v34  ;;  %v1858_v30 = vrot.slane %v1844_v26, 4 }
 0x54b   : > { %v1823_v31 = vsel %vm807_vm6, 0, %v1822_v38  ;;  %v1832_v4 = vpack.i.b16 %v1831_v57, %v1830_v42  ;;  %v1852_v32 = vpack.i.b16 %v1825_v19, %v1797_v22  ;;  %v1855_v33 = vshrl.u32 %v1825_v19, 16 }
 0x54c   : > { %v1839_v35 = vshrl.u32 %v1823_v31, 16  ;;  %v1886_v36 = vrot.slane %v1848_v63, 4  ;;  %v1836_v40 = vpack.i.b16 %v1823_v31, %v1795_v27  ;;  %v1859_v41 = vsel %vm807_vm6, %v1858_v30, %v1828_v29 }
 0x54d   : > { %v1864_v43 = vrot.slane %v1852_v32, 4  ;;  %v1856_v46 = vpack.i.b16 %v1855_v33, %v1854_v25  ;;  %v1863_v47 = vperm.slane %v1859_v41, %v3468_v44  ;;  %v2508_v41 = vld [vmem:[%s4000_s1] sm:$0xff] }
 0x54e   : > { %v1840_v17 = vpack.i.b16 %v1839_v35, %v1838_v59  ;;  %v1887_v48 = vsel %vm807_vm6, %v1886_v36, %v1832_v4 }
 0x54f   : > { %v1865_v49 = vsel %vm807_vm6, %v1864_v43, %v1836_v40  ;;  %v1872_v51 = vrot.slane %v1863_v47, 4  ;;  %v1891_v52 = vperm.slane %v1887_v48, %v3468_v44  ;;  %v1892_v53 = vrot.slane %v1856_v46, 4  ;;  %v2509_v40 = vld [vmem:[%s3999_s7 + $0x8] sm:$0xff]  ;;  %s2179_s7 = sshll.u32 %s3431_s5, 4  ;;  %s2180_s7 = int_to_ptr.vmem [resolvable:$true] %s2179_s7 }
 0x550   : > { %v1869_v54 = vperm.slane %v1865_v49, %v3468_v44  ;;  %2010 = vmatpush.bf16.msra.mxu1 %v2509_v40 }
 0x551   : > { %v1893_v56 = vsel %vm807_vm6, %v1892_v53, %v1840_v17  ;;  %v1900_v0 = vrot.slane %v1891_v52, 4 }
 0x552   : > { %v1873_v8 = vsel %vm807_vm6, %v1869_v54, %v1872_v51  ;;  %v1897_v58 = vperm.slane %v1893_v56, %v3468_v44  ;;  %v1870_v62 = vrot.slane %v1869_v54, 4 }
 0x553   : > { %v1881_v14 = vperm.slane %v1873_v8, %v3483_v55 }
 0x554   : > { %v1901_v11 = vsel %vm807_vm6, %v1897_v58, %v1900_v0  ;;  %v1871_v13 = vsel %vm807_vm6, %v1870_v62, %v1863_v47  ;;  %v1898_v6 = vrot.slane %v1897_v58, 4  ;;  %2011 = vmatpush.bf16.msra.mxu1 %v2508_v41 }
 0x555   : > { %v1909_v16 = vperm.slane %v1901_v11, %v3483_v55  ;;  %v3806_v18 = vperm.slane %v1871_v13, %v3483_v55  ;;  %v1884_v28 = vrot.slane %v1881_v14, 4  ;;  %v1929_v42 = vshrl.u32 %v1881_v14, 16  ;;  %v2716_v11 = vld [vmem:[%s3431_s5] sm:$0xff] }
 0x556   : > { %v1899_v20 = vsel %vm807_vm6, %v1898_v6, %v1891_v52 }
 0x557   : > { %v1928_v23 = vpack.i.b16 %v1909_v16, %v1881_v14  ;;  %v1905_v37 = vperm.slane %v1899_v20, %v3483_v55  ;;  %v1882_v44 = vrot.slane %v3806_v18, 4  ;;  %v1917_v60 = vshrl.u32 %v3806_v18, 16 }
 0x558   : > { %v1912_v61 = vrot.slane %v1909_v16, 4  ;;  %v1930_v12 = vshrl.u32 %v1909_v16, 16  ;;  %v1885_v45 = vsel %vm807_vm6, 0, %v1884_v28 }
 0x559   : > { %v1950_v50 = vunpack.c.l.b16 %v1928_v23  ;;  %v1918_v1 = vshrl.u32 %v1905_v37, 16  ;;  %v1883_v2 = vsel %vm807_vm6, 0, %v1882_v44  ;;  %v1910_v3 = vrot.slane %v1905_v37, 4  ;;  %v2511_v44 = vld [vmem:[%s4001_s15 + $0x8] sm:$0xff]  ;;  %s2167_s15 = scalar_lea.sflag [#allocation4], %s3378_s13 }
 0x55a   : > { %v1923_v34 = vshrl.u32 %v1883_v2, 16  ;;  %v1913_v55 = vsel %vm807_vm6, 0, %v1912_v61  ;;  %v1916_v24 = vpack.i.b16 %v1905_v37, %v3806_v18  ;;  %v1931_v27 = vpack.i.b16 %v1930_v12, %v1929_v42  ;;  %2080 = vmatpush.bf16.msra.mxu2 %v2511_v44  ;;  %v2670_v12 = vld [vmem:[%s700_s19] ss:$0 sm:$0xff]  ;;  %s4007_s19 = sld [smem:[#allocation24_spill]] }
 0x55b   : > { %v1951_v5 = vpack.c.b16 %v1950_v50, %v1950_v50  ;;  %v1919_v7 = vpack.i.b16 %v1918_v1, %v1917_v60  ;;  %v1911_v10 = vsel %vm807_vm6, 0, %v1910_v3  ;;  %v1936_v38 = vshrl.u32 %v1913_v55, 16  ;;  %v2510_v60 = vld [vmem:[%s4002_s0] sm:$0xff] }
 0x55c   : > { %v1924_v15 = vshrl.u32 %v1911_v10, 16  ;;  %v1922_v21 = vpack.i.b16 %v1911_v10, %v1883_v2  ;;  %v1935_v57 = vshrl.u32 %v1885_v45, 16  ;;  %v1934_v19 = vpack.i.b16 %v1913_v55, %v1885_v45  ;;  %v2672_v42 = vld [vmem:[%s691_s24] ss:$0 sm:$0xff] }
 0x55d   : > { %1952 = vrot.lane.b32.xlu0 %v1951_v5, %s3077_s28  ;;  %v1938_v22 = vunpack.c.l.b16 %v1919_v7  ;;  %v1954_v30 = vunpack.c.l.b16 %v1931_v27 }
 0x55e   : > { %v1925_v25 = vpack.i.b16 %v1924_v15, %v1923_v34  ;;  %v1942_v39 = vunpack.c.l.b16 %v1922_v21  ;;  %v1937_v31 = vpack.i.b16 %v1936_v38, %v1935_v57  ;;  %v1958_v4 = vunpack.c.l.b16 %v1934_v19  ;;  %2081 = vmatpush.bf16.msra.mxu2 %v2510_v60 }
 0x55f   : > { %v1939_v26 = vpack.c.b16 %v1938_v22, %v1938_v22  ;;  %v1955_v32 = vpack.c.b16 %v1954_v30, %v1954_v30 }
 0x560   : > { %v1946_v29 = vunpack.c.l.b16 %v1925_v25  ;;  %v1943_v63 = vpack.c.b16 %v1942_v39, %v1942_v39  ;;  %v1962_v33 = vunpack.c.l.b16 %v1937_v31  ;;  %v1959_v35 = vpack.c.b16 %v1958_v4, %v1958_v4  ;;  %s2499_s30 = sshll.u32 %s4007_s19, 3 }
 0x561   : > { %1940 = vrot.lane.b32.xlu2 %v1939_v26, %s3078_s2 }
 0x562   : > { %v1947_v59 = vpack.c.b16 %v1946_v29, %v1946_v29  ;;  %v1963_v36 = vpack.c.b16 %v1962_v33, %v1962_v33 }
 0x564   : > { %1948 = vrot.lane.b32.xlu1 %v1947_v59, %s3079_s11 }
 0x565   : > { %1944 = vrot.lane.b32.xlu0 %v1943_v63, %s3080_s23  ;;  %v2513_v63 = vld [vmem:[%s4005_s29 + $0x8] sm:$0xff] }
 0x566   : > { %2157 = vmatpush.bf16.msra.mxu3 %v2513_v63 }
 0x569   : > { %1956 = vrot.lane.b32.xlu2 %v1955_v32, %s3081_s6 }
 0x56c   : > { %1960 = vrot.lane.b32.xlu1 %v1959_v35, %s3082_s4  ;;  %s4009_s4 = sld [smem:[#allocation42_spill]] }
 0x56d   : > { %1964 = vrot.lane.b32.xlu0 %v1963_v36, %s3083_s26 }
 0x572   : > { %s2177_s26 = scalar_lea.hbm %s4009_s4, %s2499_s30  ;;  %s2947_s20 = scalar_lea.hbm %s4009_s4, 16 }
 0x573   : > { %s2181_s1 = sshll.u32 %s2177_s26, 4  ;;  %s2182_s1 = int_to_ptr.hbm [resolvable:$true] %s2181_s1 }
 0x574   : > { %s2941_s0 = sshra.s32 %s2182_s1, 4  ;;  %s2942_s0 = int_to_ptr.hbm [resolvable:$true] %s2941_s0 }
 0x575   : > { %s2943_s17 = scalar_lea.hbm %s2942_s0, 8  ;;  %p2948_p1 = scmp.lt.s32.totalorder %s2942_s0, %s4009_s4 }
 0x576   : > { %p2944_p10 = scmp.ne.s32.totalorder %s2942_s0, %s2943_s17  ;;  %p2949_p0 = scmp.lt.s32.totalorder %s2947_s20, %s2943_s17 }
 0x578   : > { %p2945_p11 = pnand %p2944_p10, %p3322_p13  ;;  %p2950_p5 = por %p2949_p0, %p2948_p1 }
 0x57a   : > { %p2946_p12 = pneg %p2945_p11 }
 0x57c   : > { %p2951_p6 = pnand %p2950_p5, %p2946_p12 }
 0x5bb   : > { %v1941_v46 = vpop.permute.xlu2 %1940 }
 0x5bc   : > { %v1968_v17 = vsel %vm1359_vm7, %v1916_v24, %v1941_v46 }
 0x5c3   : > { %v1957_v53 = vpop.permute.xlu2 %1956 }
 0x5cf   : > { %v1953_v43 = vpop.permute.xlu0 %1952 }
 0x5d6   : > { %v1949_v47 = vpop.permute.xlu1 %1948 }
 0x5d7   : > { %v1945_v48 = vpop.permute.xlu0 %1944 }
 0x5d8   : > { %v1970_v49 = vsel %vm1512_vm8, %v1968_v17, %v1945_v48 }
 0x5d9   : > { %v1973_v51 = vsel %vm1971_vm10, %v1970_v49, %v1949_v47 }
 0x5da   : > { %v1976_v52 = vsel %vm1974_vm11, %v1973_v51, %v1953_v43 }
 0x5db   : > { %v1979_v56 = vsel %vm1977_vm12, %v1976_v52, %v1957_v53 }
 0x5de   : > { %v1961_v54 = vpop.permute.xlu1 %1960 }
 0x5df   : > { %v1982_v0 = vsel %vm1980_vm13, %v1979_v56, %v1961_v54  ;;  %v1965_v8 = vpop.permute.xlu0 %1964 }
 0x5e0   : > { %v1985_v58 = vsel %vm1983_vm14, %v1982_v0, %v1965_v8 }
 0x5e1   : > { %2479 = vmatmul.msk.bf16.vlgmr.msra.gmra.mxu1 %vm712_vm1, %v1985_v58  ;;  %v3084_v58 = vmov -1.0  }
 0x65e   : > { %v2013_v62 = vpop.f32.mrf.mxu1 }
 0x65f   : > { %v3825_v13 = vadd.f32 %v2716_v11, %v2013_v62 }
 0x661   : > { %v2020_v6 = vsel %vm712_vm1, %v3825_v13, 0.0 }
 0x662   : > { %2021 = vadd.xlane.f32.xlu2 %v2020_v6 }
 0x666   : > { %v2015_v14 = vpop.f32.mrf.mxu1 }
 0x6d5   : > { %v2022_v16 = vpop.xlane.xlu2 %2021 }
 0x6d6   : > { %v2023_v18 = vmul.f32 %v2022_v16, %v3437_v9 }
 0x6d8   : > { %v2024_v20 = vsub.f32 %v3825_v13, %v2023_v18 }
 0x6da   : > { %v2025_v23 = vmul.f32 %v2024_v20, %v2024_v20 }
 0x6dc   : > { %v2026_v37 = vsel %vm712_vm1, %v2025_v23, 0.0 }
 0x6dd   : > { %2027 = vadd.xlane.f32.xlu1 %v2026_v37 }
 0x750   : > { %v2028_v61 = vpop.xlane.xlu1 %2027 }
 0x751   : > { %v2029_v50 = vmul.f32 %v2028_v61, %v3437_v9  ;;  %v2671_v9 = vld [vmem:[%s609_s14] ss:$0 sm:$0xff]  ;;  %s4006_s14 = smov %s4005_s29 }
 0x752   : > { %v2512_v32 = vld [vmem:[%s4006_s14] sm:$0xff] }
 0x753   : > { %v2030_v1 = vadd.f32 1e-05, %v2029_v50  ;;  %2158 = vmatpush.bf16.msra.mxu3 %v2512_v32 }
 0x755   : > { %2710 = vrsqrt.f32 %v2030_v1  ;;  %vm2037_vm0 = vweird.f32 %v2030_v1 }
 0x75b   : > { %v2711_v2 = vpop.eup %2710 }
 0x75c   : > { %v2032_v3 = vmul.f32 %v2711_v2, %v2030_v1  ;;  %vm2038_vm15 = vweird.f32 %v2711_v2 }
 0x75d   : > { %vm2039_vm2 = vmor %vm2037_vm0, %vm2038_vm15 }
 0x75e   : > { %v2033_v28 = vmul.f32 %v2711_v2, %v2032_v3 }
 0x760   : > { %v2034_v5 = vmul.f32 0.5, %v2033_v28 }
 0x762   : > { %v2035_v7 = vsub.f32 1.5, %v2034_v5 }
 0x764   : > { %v2036_v10 = vmul.f32 %v2711_v2, %v2035_v7 }
 0x766   : > { %v2040_v34 = vsel %vm2039_vm2, %v2711_v2, %v2036_v10 }
 0x767   : > { %v2041_v15 = vmul.f32 %v2040_v34, %v2024_v20  ;;  %v2673_v20 = vld [vmem:[%s694_s9] ss:$0 sm:$0xff] }
 0x769   : > { %v2045_v21 = vmul.f32 %v2670_v12, %v2041_v15 }
 0x76b   : > { %v2049_v55 = vadd.f32 %v2671_v9, %v2045_v21 }
 0x76d   : > { %v2050_v22 = vpack.c.bf16 %v2049_v55, %v2049_v55 }
 0x76f   : > { %2488 = vmatmul.msk.bf16.vlgmr.msra.gmra.mxu2 %vm712_vm1, %v2050_v22 }
 0x7f2   : > { %v2083_v24 = vpop.f32.mrf.mxu2 }
 0x7f3   : > { %v2084_v25 = vadd.f32 %v2672_v42, %v2083_v24 }
 0x7f5   : > { %v2088_v45 = vmul.f32 0.70710677, %v2084_v25  ;;  %v2087_v6 = vmul.f32 0.5, %v2084_v25 }
 0x7f7   : > { %v2091_v26 = vand.u32 2147483647, %v2088_v45  ;;  %vm2089_vm7 = vcmp.ge.f32.partialorder %v2088_v45, 0.0 }
 0x7f8   : > { %v2090_v62 = vsel %vm2089_vm7, 1.0, %v3084_v58 }
 0x7f9   : > { %v2092_v39 = vmul.f32 0.3275911, %v2091_v26  ;;  %v2118_v40 = vsub.f32 0.0, %v2091_v26 }
 0x7fa   : > { %v2085_v27 = vpop.f32.mrf.mxu2 }
 0x7fb   : > { %v2093_v38 = vadd.f32 1.0, %v2092_v39  ;;  %v2119_v46 = vmul.f32 %v2118_v40, %v2091_v26 }
 0x7fd   : > { %2712 = vrcp.f32 %v2093_v38  ;;  %v2105_v19 = vand.u32 2147483648, %v2093_v38  ;;  %v2103_v31 = vand.u32 2147483647, %v2093_v38  ;;  %vm2099_vm4 = vweird.f32 %v2093_v38 }
 0x7fe   : > { %v2120_v48 = vmul.f32 1.442695, %v2119_v46 }
 0x7ff   : > { %v2106_v33 = vor.u32 1.1754944e-38, %v2105_v19  ;;  %vm2104_vm6 = vcmp.eq.f32.partialorder %v2103_v31, 8.507059e+37 }
 0x800   : > { %2714 = vpow2.f32 %v2120_v48 }
 0x803   : > { %v2713_v29 = vpop.eup %2712 }
 0x804   : > { %v2095_v57 = vmul.f32 %v2713_v29, %v2093_v38  ;;  %vm2100_vm3 = vweird.f32 %v2713_v29 }
 0x805   : > { %vm2101_vm5 = vmor %vm2099_vm4, %vm2100_vm3 }
 0x806   : > { %v2096_v59 = vsub.f32 1.0, %v2095_v57  ;;  %v2715_v56 = vpop.eup %2714 }
 0x808   : > { %v2097_v30 = vmul.f32 %v2713_v29, %v2096_v59 }
 0x80a   : > { %v2098_v4 = vadd.f32 %v2713_v29, %v2097_v30 }
 0x80c   : > { %v2102_v35 = vsel %vm2101_vm5, %v2713_v29, %v2098_v4 }
 0x80d   : > { %v2107_v36 = vsel %vm2104_vm6, %v2106_v33, %v2102_v35 }
 0x80e   : > { %v2109_v41 = vmul.f32 1.0614054, %v2107_v36 }
 0x810   : > { %v2110_v43 = vadd.f32 -1.4531521, %v2109_v41 }
 0x812   : > { %v2111_v47 = vmul.f32 %v2110_v43, %v2107_v36 }
 0x814   : > { %v2112_v17 = vadd.f32 1.4214138, %v2111_v47 }
 0x816   : > { %v2113_v49 = vmul.f32 %v2112_v17, %v2107_v36 }
 0x818   : > { %v2114_v51 = vadd.f32 -0.28449672, %v2113_v49 }
 0x81a   : > { %v2115_v52 = vmul.f32 %v2114_v51, %v2107_v36 }
 0x81c   : > { %v2116_v53 = vadd.f32 0.2548296, %v2115_v52 }
 0x81e   : > { %v2117_v54 = vmul.f32 %v2116_v53, %v2107_v36 }
 0x820   : > { %v2122_v0 = vmul.f32 %v2715_v56, %v2117_v54 }
 0x822   : > { %v2123_v8 = vsub.f32 1.0, %v2122_v0 }
 0x824   : > { %v2124_v11 = vmul.f32 %v2123_v8, %v2090_v62 }
 0x826   : > { %v2125_v14 = vadd.f32 1.0, %v2124_v11 }
 0x828   : > { %v2126_v16 = vmul.f32 %v2125_v14, %v2087_v6 }
 0x82a   : > { %v2127_v18 = vpack.c.bf16 %v2126_v16, %v2126_v16 }
 0x82c   : > { %2497 = vmatmul.msk.bf16.vlgmr.msra.gmra.mxu3 %vm712_vm1, %v2127_v18 }
 0x8af   : > { %v2160_v23 = vpop.f32.mrf.mxu3 }
 0x8b0   : > { %v2161_v37 = vadd.f32 %v2673_v20, %v2160_v23 }
 0x8b2   : > { %v2164_v44 = vadd.f32 %v2161_v37, %v3825_v13 }
 0x8b4   : > { %2165 = vst.msk [vmem:[%s3431_s5] sm:$0xff] %vm712_vm1, %v2164_v44 }
 0x8b5   : > { %2954 = shalt.err (!%p2951_p6)
}
 0x8b6   : > { %2528 = dma.vmem_to_hbm [thread:$0]  (%p3322_p13), %s2180_s7, 128, %s2182_s1, %s2167_s15  }
 0x8b7   : > { %v2162_v13 = vpop.f32.mrf.mxu3 }
 0x8b8 PF: > { %s4010_s5 = sld [smem:[#allocation21_spill]]  ;;  %p2557_p8 = scmp.ge.s32.totalorder %s3061_s27, 2 }
 0x8ba   : > { %p2553_p2 = pnand %p2557_p8, %p3329_p3 }
 0x8bc   : > { %p2554_p9 = pneg %p2553_p2 }
 0x8be   : > { %s2193_s22 = sand.u32 1, %s4010_s5  }
 0x8bf   : > { %s2194_s28 = scalar_lea.sflag [#allocation4], %s2193_s22 }
 0x8c0   : > { %3016 = dma.done.wait (%p2554_p9), %s2194_s28, 128  }
 0x8c1   : > { %3018 = vsyncadd (%p2554_p9), %s2194_s28, 4294967168  ;;  %s36_s27 = sadd.s32 1, %s3061_s27   ;;  %s4012_s29 = sld [smem:[#allocation20_spill]] }
 0x8c2   : > { %p33_p4 = scmp.ge.s32.totalorder %s36_s27, 6   ;;  %s4013_s19 = sld [smem:[#allocation29_spill]] }
 0x8c3   : > { %s4014_s8 = sld [smem:[#allocation22_spill]]  ;;  %s4019_s17 = smov %s3025_s18 }
 0x8c4   : > { %s4015_s22 = sld [smem:[#allocation30_spill]]  ;;  %s4021_s20 = smov %s3037_s21 }
 0x8c5   : > { %s4016_s24 = sld [smem:[#allocation25_spill]]  ;;  %s4023_s23 = smov %s3053_s25 }
 0x8c6   : > { %s4017_s14 = sld [smem:[#allocation27_spill]] }
 0x8c7   : > { %s4018_s26 = sld [smem:[#allocation28_spill]]  ;;  %s4020_s18 = smov %s4012_s29 }
 0x8c8   :  { %35 = sbr.rel (!%p33_p4) target bundleno = 27 (0x1b), region = 197 }
 0x8c9   : > { %s4022_s21 = smov %s4014_s8 }
 0x8cc   : > { %s4024_s25 = smov %s4017_s14 }
 0x8cd   :  { %2200 = vsyncpa [#allocation3], 1 }
 0x8ce   :  { %2202 = vsyncpa [#allocation3 + $0x1], 1 }
 0x8cf   :  { %2203 = vsyncpa [#allocation6], 1 }
 0x8d0   :  { %2205 = vsyncpa [#allocation6 + $0x1], 1 }
 0x8d1   :  { %2206 = vsyncpa [#allocation9], 1 }
 0x8d2   :  { %2208 = vsyncpa [#allocation9 + $0x1], 1 }
 0x8d3   :  { %2209 = vsyncpa [#allocation12], 1 }
 0x8d4   :  { %2211 = vsyncpa [#allocation12 + $0x1], 1 }
 0x8d5   :  { %2212 = vsyncpa [#allocation4], 1 }
 0x8d6   :  { %2214 = vsyncpa [#allocation4 + $0x1], 1 }

</bundles_post_ra>
